<compile_context>
chip_gen: v5e
topology: v5e:2x2
jax: 0.10.0
libtpu: 0.0.40
codegen_flags: <defaults>
</compile_context>

<pallas_src>
import math

import jax
import jax.numpy as jnp
from jax.experimental import pallas as pl
from jax.experimental.pallas import tpu as pltpu

_SQRT_HALF = 0.7071067811865476
_LN_EPS = 1e-5


def _round_up(n, m):
    return ((n + m - 1) // m) * m


# ------------------------------ fused kernel ---------------------------------

def _make_encoder_kernel(cfg, vec_layout, w2_layout, S):
    enc = cfg["enc"]                 # (E0, E1, ..., E_last)
    H = cfg["heads"]
    num_blocks = len(enc) - 1
    num_ffds = cfg["num_ffds"]
    out_dim = cfg["out_dim"]

    def kernel(x_ref, vec_ref, w2_ref, w3_ref, qb_ref, o_ref):
        # ---- static-offset slab accessors -----------------------------------
        def vrow(name):                                   # (1, d) f32
            r, d = vec_layout[name]
            return vec_ref[r:r + 1, :d]

        def linear(x, wname, bname):                      # bf16 matmul, f32 acc
            r, din, dout = w2_layout[wname]
            w = w2_ref[r:r + din, :dout]                  # bf16 (din, dout)
            y = jnp.dot(x.astype(jnp.bfloat16), w,
                        preferred_element_type=jnp.float32)
            return y + vrow(bname)

        def layernorm(x, gname, bname):                   # f32 statistics
            mu = jnp.mean(x, axis=-1, keepdims=True)
            var = jnp.mean(jnp.square(x - mu), axis=-1, keepdims=True)
            xn = (x - mu) * jax.lax.rsqrt(var + _LN_EPS)
            return xn * vrow(gname) + vrow(bname)

        def gelu(x):                                      # exact erf GELU
            return 0.5 * x * (1.0 + jax.lax.erf(x * _SQRT_HALF))

        # ---- stem: LayerNorm(feature_dim) -> coordinate encoder Linear ------
        x = x_ref[0].astype(jnp.float32)                  # (S, F)
        h = layernorm(x, "norm_g", "norm_b")
        h = linear(h, "coord_w", "coord_b")               # (S, E0)

        # ---- transformer encoder blocks (statically unrolled) ----------------
        for i in range(num_blocks):
            E = enc[i]
            Dh = E // H
            scale = 1.0 / math.sqrt(Dh)

            def w3(j, _i=i, _E=E, _Dh=Dh):                # (H, E, Dh) bf16
                s0 = (4 * _i + j) * H
                return w3_ref[s0:s0 + H, :_E, :_Dh]

            def qbias(j, _i=i, _Dh=Dh):                   # (H, 1, Dh) f32
                s0 = (3 * _i + j) * H
                return qb_ref[s0:s0 + H, :, :_Dh]

            # residual 1: pre-LN multi-head self-attention (dropout = identity)
            hn = layernorm(h, f"blk{i}_ln1_g", f"blk{i}_ln1_b")
            hnb = jnp.broadcast_to(hn.astype(jnp.bfloat16)[None], (H, S, E))

            q = jnp.einsum("hse,hed->hsd", hnb, w3(0),
                           preferred_element_type=jnp.float32) + qbias(0)
            k = jnp.einsum("hse,hed->hsd", hnb, w3(1),
                           preferred_element_type=jnp.float32) + qbias(1)
            v = jnp.einsum("hse,hed->hsd", hnb, w3(2),
                           preferred_element_type=jnp.float32) + qbias(2)

            s = jnp.einsum("hqd,hkd->hqk",
                           q.astype(jnp.bfloat16), k.astype(jnp.bfloat16),
                           preferred_element_type=jnp.float32) * scale
            s = s - jnp.max(s, axis=-1, keepdims=True)
            e = jnp.exp(s)
            p = e * pl.reciprocal(jnp.sum(e, axis=-1, keepdims=True),
                                  approx=True)

            o = jnp.einsum("hqk,hkd->hqd",
                           p.astype(jnp.bfloat16), v.astype(jnp.bfloat16),
                           preferred_element_type=jnp.float32)
            # per-head out-projection (weights stored transposed so the
            # contraction is over the last dim), then merge heads by summing
            proj = jnp.einsum("hsd,hed->hse",
                              o.astype(jnp.bfloat16), w3(3),
                              preferred_element_type=jnp.float32)
            attn = jnp.sum(proj, axis=0) + vrow(f"blk{i}_out_b")
            h = h + attn

            # residual 2: pre-LN feed-forward (dropout = identity)
            hn = layernorm(h, f"blk{i}_ln2_g", f"blk{i}_ln2_b")
            ff = gelu(linear(hn, f"blk{i}_ff1_w", f"blk{i}_ff1_b"))
            ff = linear(ff, f"blk{i}_ff2_w", f"blk{i}_ff2_b")
            h = h + ff

            # block output projection + GELU
            h = gelu(linear(h, f"blk{i}_proj_w", f"blk{i}_proj_b"))

        # ---- einops.reduce 'b s feat -> b feat', 'max' (batch = grid axis) ---
        h = jnp.max(h, axis=0, keepdims=True)             # (1, E_last)

        # ---- FFD stack: LayerNorm -> Linear -> GELU (dropout = identity) -----
        for j in range(num_ffds):
            h = layernorm(h, f"ffd{j}_ln_g", f"ffd{j}_ln_b")
            h = gelu(linear(h, f"ffd{j}_w", f"ffd{j}_b"))

        # ---- final Linear + L2 normalization (no eps, matches torch ref) -----
        h = linear(h, "final_w", "final_b")               # (1, out_dim)
        inv = jax.lax.rsqrt(jnp.sum(h * h, axis=-1, keepdims=True))
        o_ref[...] = (h * inv).reshape(1, 1, out_dim)

    return kernel


# ----------------------------- parameter setup -------------------------------

def _init_linear(key, din, dout, scale=0.05):
    kw, kb = jax.random.split(key)
    w = jax.random.normal(kw, (din, dout), jnp.float32) * scale
    b = jax.random.normal(kb, (1, dout), jnp.float32) * scale
    return w, b


def _init_ln(d):
    return jnp.ones((1, d), jnp.float32), jnp.zeros((1, d), jnp.float32)


def init_encoder_params(key, feature_dim, encoders, fcc, expansion):
    keys = iter(jax.random.split(key, 128))
    p = {}
    p["norm_g"], p["norm_b"] = _init_ln(feature_dim)
    p["coord_w"], p["coord_b"] = _init_linear(next(keys), feature_dim, encoders[0])

    blocks = []
    for i in range(len(encoders) - 1):
        e_in, e_out = encoders[i], encoders[i + 1]
        hid = int(e_in * expansion)
        blk = {}
        blk["ln1_g"], blk["ln1_b"] = _init_ln(e_in)
        blk["in_w"], blk["in_b"] = _init_linear(next(keys), e_in, 3 * e_in)
        blk["out_w"], blk["out_b"] = _init_linear(next(keys), e_in, e_in)
        blk["ln2_g"], blk["ln2_b"] = _init_ln(e_in)
        blk["ff1_w"], blk["ff1_b"] = _init_linear(next(keys), e_in, hid)
        blk["ff2_w"], blk["ff2_b"] = _init_linear(next(keys), hid, e_in)
        blk["proj_w"], blk["proj_b"] = _init_linear(next(keys), e_in, e_out)
        blocks.append(blk)
    p["blocks"] = blocks

    fcc_full = [encoders[-1]] + list(fcc)
    ffds = []
    for din, dout in zip(fcc_full[:-1], fcc_full[1:]):
        f = {}
        f["ln_g"], f["ln_b"] = _init_ln(din)
        f["w"], f["b"] = _init_linear(next(keys), din, dout)
        ffds.append(f)
    p["ffds"] = ffds
    p["final_w"], p["final_b"] = _init_linear(next(keys), fcc_full[-1], fcc_full[-1])
    return p


# -------------------- one-time wrapper-side parameter packing -----------------

def pack_encoder_params(params, num_heads):
    """Packs all parameters into 4 VMEM slabs + static layout dictionaries."""
    H = num_heads
    f32 = jnp.float32
    VCOLS, WCOLS = 128, 128

    # --- vector slab: every LN gain/bias and every Linear bias (one DMA) -----
    vec_entries = []

    def addv(name, a):
        vec_entries.append((name, jnp.asarray(a, f32).reshape(-1)))

    addv("norm_g", params["norm_g"]); addv("norm_b", params["norm_b"])
    addv("coord_b", params["coord_b"])
    for i, blk in enumerate(params["blocks"]):
        addv(f"blk{i}_ln1_g", blk["ln1_g"]); addv(f"blk{i}_ln1_b", blk["ln1_b"])
        addv(f"blk{i}_out_b", blk["out_b"])
        addv(f"blk{i}_ln2_g", blk["ln2_g"]); addv(f"blk{i}_ln2_b", blk["ln2_b"])
        addv(f"blk{i}_ff1_b", blk["ff1_b"]); addv(f"blk{i}_ff2_b", blk["ff2_b"])
        addv(f"blk{i}_proj_b", blk["proj_b"])
    for j, f in enumerate(params["ffds"]):
        addv(f"ffd{j}_ln_g", f["ln_g"]); addv(f"ffd{j}_ln_b", f["ln_b"])
        addv(f"ffd{j}_b", f["b"])
    addv("final_b", params["final_b"])

    vec_slab = jnp.zeros((_round_up(len(vec_entries), 8), VCOLS), f32)
    vec_layout = {}
    for r, (name, a) in enumerate(vec_entries):
        d = int(a.shape[0])
        assert d <= VCOLS
        vec_layout[name] = (r, d)
        vec_slab = vec_slab.at[r, :d].set(a)

    # --- 2-D weight slab (bf16, one DMA): all plain Linear weights -----------
    w_entries = []

    def addw(name, w):
        w_entries.append((name, jnp.asarray(w, f32)))

    addw("coord_w", params["coord_w"])
    for i, blk in enumerate(params["blocks"]):
        addw(f"blk{i}_ff1_w", blk["ff1_w"]); addw(f"blk{i}_ff2_w", blk["ff2_w"])
        addw(f"blk{i}_proj_w", blk["proj_w"])
    for j, f in enumerate(params["ffds"]):
        addw(f"ffd{j}_w", f["w"])
    addw("final_w", params["final_w"])

    w2_layout, chunks, row = {}, [], 0
    for name, w in w_entries:
        din, dout = int(w.shape[0]), int(w.shape[1])
        assert dout <= WCOLS
        pad_rows = _round_up(din, 16)              # bf16 (16,128) tile aligned
        buf = jnp.zeros((pad_rows, WCOLS), f32).at[:din, :dout].set(w)
        w2_layout[name] = (row, din, dout)
        chunks.append(buf)
        row += pad_rows
    w2_slab = jnp.concatenate(chunks, axis=0).astype(jnp.bfloat16)

    # --- per-head attention weights (bf16) + per-head QKV biases (f32) -------
    blocks = params["blocks"]
    nb = len(blocks)
    Es = [int(blk["ln1_g"].size) for blk in blocks]
    for E in Es:
        assert E % H == 0, "embed dim must be divisible by num_heads"
    maxE = max(Es)
    maxDh = max(E // H for E in Es)
    w3 = jnp.zeros((nb * 4 * H, maxE, maxDh), f32)
    qb = jnp.zeros((nb * 3 * H, 1, maxDh), f32)
    for i, blk in enumerate(blocks):
        E = Es[i]
        Dh = E // H
        in_w = jnp.asarray(blk["in_w"], f32)               # (E, 3E), x@W layout
        in_b = jnp.asarray(blk["in_b"], f32).reshape(-1)   # (3E,)
        out_w = jnp.asarray(blk["out_w"], f32)             # (E, E),  x@W layout
        mats = []
        for j in range(3):                                 # Wq, Wk, Wv -> (H,E,Dh)
            wj = in_w[:, j * E:(j + 1) * E]
            mats.append(jnp.transpose(wj.reshape(E, H, Dh), (1, 0, 2)))
        # per-head out-proj, transposed so the kernel contracts over the last dim
        mats.append(jnp.transpose(out_w.reshape(H, Dh, E), (0, 2, 1)))
        for j, m in enumerate(mats):
            s0 = (4 * i + j) * H
            w3 = w3.at[s0:s0 + H, :E, :Dh].set(m)
        for j in range(3):
            bj = in_b[j * E:(j + 1) * E].reshape(H, 1, Dh)
            s0 = (3 * i + j) * H
            qb = qb.at[s0:s0 + H, :, :Dh].set(bj)
    w3_slab = w3.astype(jnp.bfloat16)

    cfg = {
        "enc": tuple(Es) + (int(blocks[-1]["proj_w"].shape[1]),),
        "heads": H,
        "num_ffds": len(params["ffds"]),
        "out_dim": int(params["final_w"].shape[1]),
    }
    return (vec_slab, w2_slab, w3_slab, qb), vec_layout, w2_layout, cfg


# ----------------------------- forward wrappers -------------------------------

def make_encoder_forward(params, num_heads):
    """Packs params once and returns a jitted Encoder.forward."""
    slabs, vec_layout, w2_layout, cfg = pack_encoder_params(params, num_heads)
    vec_slab, w2_slab, w3_slab, qb_slab = slabs
    out_dim = cfg["out_dim"]

    @jax.jit
    def fwd(x):
        B, S, F = x.shape
        kernel = _make_encoder_kernel(cfg, vec_layout, w2_layout, S)
        out = pl.pallas_call(
            kernel,
            out_shape=jax.ShapeDtypeStruct((B, 1, out_dim), jnp.float32),
            grid=(B,),
            in_specs=[
                pl.BlockSpec((1, S, F), lambda b: (b, 0, 0)),
                pl.BlockSpec(vec_slab.shape, lambda b: (0, 0)),
                pl.BlockSpec(w2_slab.shape, lambda b: (0, 0)),
                pl.BlockSpec(w3_slab.shape, lambda b: (0, 0, 0)),
                pl.BlockSpec(qb_slab.shape, lambda b: (0, 0, 0)),
            ],
            out_specs=pl.BlockSpec((1, 1, out_dim), lambda b: (b, 0, 0)),
            compiler_params=pltpu.CompilerParams(
                dimension_semantics=("parallel",),
                vmem_limit_bytes=32 * 1024 * 1024),
        )(x, vec_slab, w2_slab, w3_slab, qb_slab)
        return out.reshape(B, out_dim)

    return fwd


def keypoint_siamese_forward(encoder_fn, x, y=None):
    encoded_x = encoder_fn(x)
    if y is None:
        return encoded_x
    encoded_y = encoder_fn(y)
    return encoded_x, encoded_y


# ----------------------------------- main -------------------------------------

if __name__ == "__main__":
    B, S = 2, 8
    feature_dim = 16
    encoders = [32, 32]     # one transformer block, E_in = E_out = 32
    fcc = [16]              # -> fcc_full = [32, 16]; output dim = 16
    num_heads = 4
    expansion = 2.0

    key = jax.random.PRNGKey(0)
    kp, kx, ky = jax.random.split(key, 3)
    params = init_encoder_params(kp, feature_dim, encoders, fcc, expansion)
    x = jax.random.normal(kx, (B, S, feature_dim), jnp.float32)
    y = jax.random.normal(ky, (B, S, feature_dim), jnp.float32)

    encoder_fn = make_encoder_forward(params, num_heads)
    enc_x, enc_y = keypoint_siamese_forward(encoder_fn, x, y)
    enc_x, enc_y = jax.block_until_ready((enc_x, enc_y))

    out_dim = fcc[-1]
    assert enc_x.shape == (B, out_dim), enc_x.shape
    assert enc_y.shape == (B, out_dim), enc_y.shape
    assert bool(jnp.all(jnp.isfinite(enc_x)))
    assert bool(jnp.all(jnp.isfinite(enc_y)))
    for o in (enc_x, enc_y):
        norms = jnp.linalg.norm(o, axis=-1)
        assert bool(jnp.all(jnp.abs(norms - 1.0) < 1e-3)), norms
    print("KERNEL_OK")
</pallas_src>

<mosaic_0001>
module attributes {stable_mosaic.version = 11 : i64} {
  func.func @kernel(%arg0: i32, %arg1: memref<1x8x16xf32, #tpu.memory_space<vmem>>, %arg2: memref<16x128xf32, #tpu.memory_space<vmem>>, %arg3: memref<192x128xbf16, #tpu.memory_space<vmem>>, %arg4: memref<16x32x8xbf16, #tpu.memory_space<vmem>>, %arg5: memref<12x1x8xf32, #tpu.memory_space<vmem>>, %arg6: memref<1x1x16xf32, #tpu.memory_space<vmem>>) attributes {dimension_semantics = [#tpu.dimension_semantics<parallel>], iteration_bounds = array<i64: 2>, scalar_prefetch = 0 : i64, scratch_operands = 0 : i64, tpu.core_type = #tpu.core_type<tc>, window_params = [{transform_indices = @transform_0, window_bounds = array<i64: 1, 8, 16>}, {pipeline_mode = #tpu.pipeline_mode<synchronous>, transform_indices = @transform_1, window_bounds = array<i64: 16, 128>}, {pipeline_mode = #tpu.pipeline_mode<synchronous>, transform_indices = @transform_2, window_bounds = array<i64: 192, 128>}, {pipeline_mode = #tpu.pipeline_mode<synchronous>, transform_indices = @transform_3, window_bounds = array<i64: 16, 32, 8>}, {pipeline_mode = #tpu.pipeline_mode<synchronous>, transform_indices = @transform_4, window_bounds = array<i64: 12, 1, 8>}, {transform_indices = @transform_5, window_bounds = array<i64: 1, 1, 16>}]} {
    %c0 = arith.constant 0 : index
    %c0_0 = arith.constant 0 : index
    %c0_1 = arith.constant 0 : index
    %0 = vector.load %arg1[%c0, %c0_0, %c0_1] : memref<1x8x16xf32, #tpu.memory_space<vmem>>, vector<1x8x16xf32>
    %1 = vector.shape_cast %0 : vector<1x8x16xf32> to vector<8x16xf32>
    %cst = arith.constant dense<0.000000e+00> : vector<8xf32>
    %2 = vector.multi_reduction <add>, %1, %cst [1] : vector<8x16xf32> to vector<8xf32>
    %3 = vector.shape_cast %2 : vector<8xf32> to vector<8x1xf32>
    %cst_2 = arith.constant 1.600000e+01 : f32
    %4 = vector.broadcast %cst_2 : f32 to vector<8x1xf32>
    %5 = arith.divf %3, %4 : vector<8x1xf32>
    %6 = vector.broadcast %5 : vector<8x1xf32> to vector<8x16xf32>
    %7 = arith.subf %1, %6 : vector<8x16xf32>
    %8 = arith.mulf %7, %7 : vector<8x16xf32>
    %cst_3 = arith.constant dense<0.000000e+00> : vector<8xf32>
    %9 = vector.multi_reduction <add>, %8, %cst_3 [1] : vector<8x16xf32> to vector<8xf32>
    %10 = vector.shape_cast %9 : vector<8xf32> to vector<8x1xf32>
    %cst_4 = arith.constant 1.600000e+01 : f32
    %11 = vector.broadcast %cst_4 : f32 to vector<8x1xf32>
    %12 = arith.divf %10, %11 : vector<8x1xf32>
    %13 = vector.broadcast %5 : vector<8x1xf32> to vector<8x16xf32>
    %14 = arith.subf %1, %13 : vector<8x16xf32>
    %cst_5 = arith.constant 9.99999974E-6 : f32
    %15 = vector.broadcast %cst_5 : f32 to vector<8x1xf32>
    %16 = arith.addf %12, %15 : vector<8x1xf32>
    %17 = math.rsqrt %16 : vector<8x1xf32>
    %18 = vector.broadcast %17 : vector<8x1xf32> to vector<8x16xf32>
    %19 = arith.mulf %14, %18 : vector<8x16xf32>
    %c0_6 = arith.constant 0 : index
    %c0_7 = arith.constant 0 : index
    %20 = vector.load %arg2[%c0_6, %c0_7] : memref<16x128xf32, #tpu.memory_space<vmem>>, vector<1x16xf32>
    %21 = vector.broadcast %20 : vector<1x16xf32> to vector<8x16xf32>
    %22 = arith.mulf %19, %21 : vector<8x16xf32>
    %c1 = arith.constant 1 : index
    %c0_8 = arith.constant 0 : index
    %23 = vector.load %arg2[%c1, %c0_8] : memref<16x128xf32, #tpu.memory_space<vmem>>, vector<1x16xf32>
    %24 = vector.broadcast %23 : vector<1x16xf32> to vector<8x16xf32>
    %25 = arith.addf %22, %24 : vector<8x16xf32>
    %c0_9 = arith.constant 0 : index
    %c0_10 = arith.constant 0 : index
    %26 = vector.load %arg3[%c0_9, %c0_10] : memref<192x128xbf16, #tpu.memory_space<vmem>>, vector<16x32xbf16>
    %27 = arith.truncf %25 : vector<8x16xf32> to vector<8x16xbf16>
    %cst_11 = arith.constant dense<0.000000e+00> : vector<8x32xf32>
    %28 = tpu.matmul %27, %26, %cst_11 {dimension_numbers = #tpu.dot_dimension_numbers<[1], [0], [0], [1], [0, 0, 1, 1], [], []>} : vector<8x16xbf16>, vector<16x32xbf16>, vector<8x32xf32> -> vector<8x32xf32>
    %c2 = arith.constant 2 : index
    %c0_12 = arith.constant 0 : index
    %29 = vector.load %arg2[%c2, %c0_12] : memref<16x128xf32, #tpu.memory_space<vmem>>, vector<1x32xf32>
    %30 = vector.broadcast %29 : vector<1x32xf32> to vector<8x32xf32>
    %31 = arith.addf %28, %30 : vector<8x32xf32>
    %cst_13 = arith.constant dense<0.000000e+00> : vector<8xf32>
    %32 = vector.multi_reduction <add>, %31, %cst_13 [1] : vector<8x32xf32> to vector<8xf32>
    %33 = vector.shape_cast %32 : vector<8xf32> to vector<8x1xf32>
    %cst_14 = arith.constant 3.200000e+01 : f32
    %34 = vector.broadcast %cst_14 : f32 to vector<8x1xf32>
    %35 = arith.divf %33, %34 : vector<8x1xf32>
    %36 = vector.broadcast %35 : vector<8x1xf32> to vector<8x32xf32>
    %37 = arith.subf %31, %36 : vector<8x32xf32>
    %38 = arith.mulf %37, %37 : vector<8x32xf32>
    %cst_15 = arith.constant dense<0.000000e+00> : vector<8xf32>
    %39 = vector.multi_reduction <add>, %38, %cst_15 [1] : vector<8x32xf32> to vector<8xf32>
    %40 = vector.shape_cast %39 : vector<8xf32> to vector<8x1xf32>
    %cst_16 = arith.constant 3.200000e+01 : f32
    %41 = vector.broadcast %cst_16 : f32 to vector<8x1xf32>
    %42 = arith.divf %40, %41 : vector<8x1xf32>
    %43 = vector.broadcast %35 : vector<8x1xf32> to vector<8x32xf32>
    %44 = arith.subf %31, %43 : vector<8x32xf32>
    %cst_17 = arith.constant 9.99999974E-6 : f32
    %45 = vector.broadcast %cst_17 : f32 to vector<8x1xf32>
    %46 = arith.addf %42, %45 : vector<8x1xf32>
    %47 = math.rsqrt %46 : vector<8x1xf32>
    %48 = vector.broadcast %47 : vector<8x1xf32> to vector<8x32xf32>
    %49 = arith.mulf %44, %48 : vector<8x32xf32>
    %c3 = arith.constant 3 : index
    %c0_18 = arith.constant 0 : index
    %50 = vector.load %arg2[%c3, %c0_18] : memref<16x128xf32, #tpu.memory_space<vmem>>, vector<1x32xf32>
    %51 = vector.broadcast %50 : vector<1x32xf32> to vector<8x32xf32>
    %52 = arith.mulf %49, %51 : vector<8x32xf32>
    %c4 = arith.constant 4 : index
    %c0_19 = arith.constant 0 : index
    %53 = vector.load %arg2[%c4, %c0_19] : memref<16x128xf32, #tpu.memory_space<vmem>>, vector<1x32xf32>
    %54 = vector.broadcast %53 : vector<1x32xf32> to vector<8x32xf32>
    %55 = arith.addf %52, %54 : vector<8x32xf32>
    %56 = arith.truncf %55 : vector<8x32xf32> to vector<8x32xbf16>
    %57 = vector.shape_cast %56 : vector<8x32xbf16> to vector<1x8x32xbf16>
    %58 = vector.shape_cast %57 : vector<1x8x32xbf16> to vector<1x8x32xbf16>
    %59 = vector.broadcast %58 : vector<1x8x32xbf16> to vector<4x8x32xbf16>
    %c0_20 = arith.constant 0 : index
    %c0_21 = arith.constant 0 : index
    %c0_22 = arith.constant 0 : index
    %60 = vector.load %arg4[%c0_20, %c0_21, %c0_22] : memref<16x32x8xbf16, #tpu.memory_space<vmem>>, vector<4x32x8xbf16>
    "tpu.trace_start"() <{level = 10 : i32, message = "hse,hed->hsd"}> : () -> ()
    %cst_23 = arith.constant dense<0.000000e+00> : vector<4x8x8xf32>
    %61 = tpu.matmul %59, %60, %cst_23 {dimension_numbers = #tpu.dot_dimension_numbers<[2], [1], [1], [2], [0, 0, 0, 1, 1, 2], [0], [0]>} : vector<4x8x32xbf16>, vector<4x32x8xbf16>, vector<4x8x8xf32> -> vector<4x8x8xf32>
    "tpu.trace_stop"() : () -> ()
    %c0_24 = arith.constant 0 : index
    %c0_25 = arith.constant 0 : index
    %c0_26 = arith.constant 0 : index
    %62 = vector.load %arg5[%c0_24, %c0_25, %c0_26] : memref<12x1x8xf32, #tpu.memory_space<vmem>>, vector<4x1x8xf32>
    %63 = vector.broadcast %62 : vector<4x1x8xf32> to vector<4x8x8xf32>
    %64 = arith.addf %61, %63 : vector<4x8x8xf32>
    %c4_27 = arith.constant 4 : index
    %c0_28 = arith.constant 0 : index
    %c0_29 = arith.constant 0 : index
    %65 = vector.load %arg4[%c4_27, %c0_28, %c0_29] : memref<16x32x8xbf16, #tpu.memory_space<vmem>>, vector<4x32x8xbf16>
    "tpu.trace_start"() <{level = 10 : i32, message = "hse,hed->hsd"}> : () -> ()
    %cst_30 = arith.constant dense<0.000000e+00> : vector<4x8x8xf32>
    %66 = tpu.matmul %59, %65, %cst_30 {dimension_numbers = #tpu.dot_dimension_numbers<[2], [1], [1], [2], [0, 0, 0, 1, 1, 2], [0], [0]>} : vector<4x8x32xbf16>, vector<4x32x8xbf16>, vector<4x8x8xf32> -> vector<4x8x8xf32>
    "tpu.trace_stop"() : () -> ()
    %c4_31 = arith.constant 4 : index
    %c0_32 = arith.constant 0 : index
    %c0_33 = arith.constant 0 : index
    %67 = vector.load %arg5[%c4_31, %c0_32, %c0_33] : memref<12x1x8xf32, #tpu.memory_space<vmem>>, vector<4x1x8xf32>
    %68 = vector.broadcast %67 : vector<4x1x8xf32> to vector<4x8x8xf32>
    %69 = arith.addf %66, %68 : vector<4x8x8xf32>
    %c8 = arith.constant 8 : index
    %c0_34 = arith.constant 0 : index
    %c0_35 = arith.constant 0 : index
    %70 = vector.load %arg4[%c8, %c0_34, %c0_35] : memref<16x32x8xbf16, #tpu.memory_space<vmem>>, vector<4x32x8xbf16>
    "tpu.trace_start"() <{level = 10 : i32, message = "hse,hed->hsd"}> : () -> ()
    %cst_36 = arith.constant dense<0.000000e+00> : vector<4x8x8xf32>
    %71 = tpu.matmul %59, %70, %cst_36 {dimension_numbers = #tpu.dot_dimension_numbers<[2], [1], [1], [2], [0, 0, 0, 1, 1, 2], [0], [0]>} : vector<4x8x32xbf16>, vector<4x32x8xbf16>, vector<4x8x8xf32> -> vector<4x8x8xf32>
    "tpu.trace_stop"() : () -> ()
    %c8_37 = arith.constant 8 : index
    %c0_38 = arith.constant 0 : index
    %c0_39 = arith.constant 0 : index
    %72 = vector.load %arg5[%c8_37, %c0_38, %c0_39] : memref<12x1x8xf32, #tpu.memory_space<vmem>>, vector<4x1x8xf32>
    %73 = vector.broadcast %72 : vector<4x1x8xf32> to vector<4x8x8xf32>
    %74 = arith.addf %71, %73 : vector<4x8x8xf32>
    %75 = arith.truncf %64 : vector<4x8x8xf32> to vector<4x8x8xbf16>
    %76 = arith.truncf %69 : vector<4x8x8xf32> to vector<4x8x8xbf16>
    "tpu.trace_start"() <{level = 10 : i32, message = "hqd,hkd->hqk"}> : () -> ()
    %cst_40 = arith.constant dense<0.000000e+00> : vector<4x8x8xf32>
    %77 = tpu.matmul %75, %76, %cst_40 {dimension_numbers = #tpu.dot_dimension_numbers<[2], [2], [1], [1], [0, 0, 0, 1, 1, 1], [0], [0]>} : vector<4x8x8xbf16>, vector<4x8x8xbf16>, vector<4x8x8xf32> -> vector<4x8x8xf32>
    "tpu.trace_stop"() : () -> ()
    %cst_41 = arith.constant 0.353553385 : f32
    %78 = vector.broadcast %cst_41 : f32 to vector<4x8x8xf32>
    %79 = arith.mulf %77, %78 : vector<4x8x8xf32>
    %cst_42 = arith.constant dense<0xFF800000> : vector<4x8xf32>
    %80 = vector.multi_reduction <maximumf>, %79, %cst_42 [2] : vector<4x8x8xf32> to vector<4x8xf32>
    %81 = vector.shape_cast %80 : vector<4x8xf32> to vector<4x8x1xf32>
    %82 = vector.broadcast %81 : vector<4x8x1xf32> to vector<4x8x8xf32>
    %83 = arith.subf %79, %82 : vector<4x8x8xf32>
    %84 = math.exp %83 : vector<4x8x8xf32>
    %cst_43 = arith.constant dense<0.000000e+00> : vector<4x8xf32>
    %85 = vector.multi_reduction <add>, %84, %cst_43 [2] : vector<4x8x8xf32> to vector<4x8xf32>
    %86 = vector.shape_cast %85 : vector<4x8xf32> to vector<4x8x1xf32>
    %87 = tpu.reciprocal %86 {approx = true} : vector<4x8x1xf32> -> vector<4x8x1xf32>
    %88 = vector.broadcast %87 : vector<4x8x1xf32> to vector<4x8x8xf32>
    %89 = arith.mulf %84, %88 : vector<4x8x8xf32>
    %90 = arith.truncf %89 : vector<4x8x8xf32> to vector<4x8x8xbf16>
    %91 = arith.truncf %74 : vector<4x8x8xf32> to vector<4x8x8xbf16>
    "tpu.trace_start"() <{level = 10 : i32, message = "hqk,hkd->hqd"}> : () -> ()
    %cst_44 = arith.constant dense<0.000000e+00> : vector<4x8x8xf32>
    %92 = tpu.matmul %90, %91, %cst_44 {dimension_numbers = #tpu.dot_dimension_numbers<[2], [1], [1], [2], [0, 0, 0, 1, 1, 2], [0], [0]>} : vector<4x8x8xbf16>, vector<4x8x8xbf16>, vector<4x8x8xf32> -> vector<4x8x8xf32>
    "tpu.trace_stop"() : () -> ()
    %93 = arith.truncf %92 : vector<4x8x8xf32> to vector<4x8x8xbf16>
    %c12 = arith.constant 12 : index
    %c0_45 = arith.constant 0 : index
    %c0_46 = arith.constant 0 : index
    %94 = vector.load %arg4[%c12, %c0_45, %c0_46] : memref<16x32x8xbf16, #tpu.memory_space<vmem>>, vector<4x32x8xbf16>
    "tpu.trace_start"() <{level = 10 : i32, message = "hsd,hed->hse"}> : () -> ()
    %cst_47 = arith.constant dense<0.000000e+00> : vector<4x8x32xf32>
    %95 = tpu.matmul %93, %94, %cst_47 {dimension_numbers = #tpu.dot_dimension_numbers<[2], [2], [1], [1], [0, 0, 0, 1, 1, 1], [0], [0]>} : vector<4x8x8xbf16>, vector<4x32x8xbf16>, vector<4x8x32xf32> -> vector<4x8x32xf32>
    "tpu.trace_stop"() : () -> ()
    %cst_48 = arith.constant dense<0.000000e+00> : vector<8x32xf32>
    %96 = vector.multi_reduction <add>, %95, %cst_48 [0] : vector<4x8x32xf32> to vector<8x32xf32>
    %c5 = arith.constant 5 : index
    %c0_49 = arith.constant 0 : index
    %97 = vector.load %arg2[%c5, %c0_49] : memref<16x128xf32, #tpu.memory_space<vmem>>, vector<1x32xf32>
    %98 = vector.broadcast %97 : vector<1x32xf32> to vector<8x32xf32>
    %99 = arith.addf %96, %98 : vector<8x32xf32>
    %100 = arith.addf %31, %99 : vector<8x32xf32>
    %cst_50 = arith.constant dense<0.000000e+00> : vector<8xf32>
    %101 = vector.multi_reduction <add>, %100, %cst_50 [1] : vector<8x32xf32> to vector<8xf32>
    %102 = vector.shape_cast %101 : vector<8xf32> to vector<8x1xf32>
    %cst_51 = arith.constant 3.200000e+01 : f32
    %103 = vector.broadcast %cst_51 : f32 to vector<8x1xf32>
    %104 = arith.divf %102, %103 : vector<8x1xf32>
    %105 = vector.broadcast %104 : vector<8x1xf32> to vector<8x32xf32>
    %106 = arith.subf %100, %105 : vector<8x32xf32>
    %107 = arith.mulf %106, %106 : vector<8x32xf32>
    %cst_52 = arith.constant dense<0.000000e+00> : vector<8xf32>
    %108 = vector.multi_reduction <add>, %107, %cst_52 [1] : vector<8x32xf32> to vector<8xf32>
    %109 = vector.shape_cast %108 : vector<8xf32> to vector<8x1xf32>
    %cst_53 = arith.constant 3.200000e+01 : f32
    %110 = vector.broadcast %cst_53 : f32 to vector<8x1xf32>
    %111 = arith.divf %109, %110 : vector<8x1xf32>
    %112 = vector.broadcast %104 : vector<8x1xf32> to vector<8x32xf32>
    %113 = arith.subf %100, %112 : vector<8x32xf32>
    %cst_54 = arith.constant 9.99999974E-6 : f32
    %114 = vector.broadcast %cst_54 : f32 to vector<8x1xf32>
    %115 = arith.addf %111, %114 : vector<8x1xf32>
    %116 = math.rsqrt %115 : vector<8x1xf32>
    %117 = vector.broadcast %116 : vector<8x1xf32> to vector<8x32xf32>
    %118 = arith.mulf %113, %117 : vector<8x32xf32>
    %c6 = arith.constant 6 : index
    %c0_55 = arith.constant 0 : index
    %119 = vector.load %arg2[%c6, %c0_55] : memref<16x128xf32, #tpu.memory_space<vmem>>, vector<1x32xf32>
    %120 = vector.broadcast %119 : vector<1x32xf32> to vector<8x32xf32>
    %121 = arith.mulf %118, %120 : vector<8x32xf32>
    %c7 = arith.constant 7 : index
    %c0_56 = arith.constant 0 : index
    %122 = vector.load %arg2[%c7, %c0_56] : memref<16x128xf32, #tpu.memory_space<vmem>>, vector<1x32xf32>
    %123 = vector.broadcast %122 : vector<1x32xf32> to vector<8x32xf32>
    %124 = arith.addf %121, %123 : vector<8x32xf32>
    %c16 = arith.constant 16 : index
    %c0_57 = arith.constant 0 : index
    %125 = vector.load %arg3[%c16, %c0_57] : memref<192x128xbf16, #tpu.memory_space<vmem>>, vector<32x64xbf16>
    %126 = arith.truncf %124 : vector<8x32xf32> to vector<8x32xbf16>
    %cst_58 = arith.constant dense<0.000000e+00> : vector<8x64xf32>
    %127 = tpu.matmul %126, %125, %cst_58 {dimension_numbers = #tpu.dot_dimension_numbers<[1], [0], [0], [1], [0, 0, 1, 1], [], []>} : vector<8x32xbf16>, vector<32x64xbf16>, vector<8x64xf32> -> vector<8x64xf32>
    %c8_59 = arith.constant 8 : index
    %c0_60 = arith.constant 0 : index
    %128 = vector.load %arg2[%c8_59, %c0_60] : memref<16x128xf32, #tpu.memory_space<vmem>>, vector<1x64xf32>
    %129 = vector.broadcast %128 : vector<1x64xf32> to vector<8x64xf32>
    %130 = arith.addf %127, %129 : vector<8x64xf32>
    %cst_61 = arith.constant 5.000000e-01 : f32
    %131 = vector.broadcast %cst_61 : f32 to vector<8x64xf32>
    %132 = arith.mulf %131, %130 : vector<8x64xf32>
    %cst_62 = arith.constant 0.707106769 : f32
    %133 = vector.broadcast %cst_62 : f32 to vector<8x64xf32>
    %134 = arith.mulf %130, %133 : vector<8x64xf32>
    %135 = math.erf %134 : vector<8x64xf32>
    %cst_63 = arith.constant 1.000000e+00 : f32
    %136 = vector.broadcast %cst_63 : f32 to vector<8x64xf32>
    %137 = arith.addf %136, %135 : vector<8x64xf32>
    %138 = arith.mulf %132, %137 : vector<8x64xf32>
    %c48 = arith.constant 48 : index
    %c0_64 = arith.constant 0 : index
    %139 = vector.load %arg3[%c48, %c0_64] : memref<192x128xbf16, #tpu.memory_space<vmem>>, vector<64x32xbf16>
    %140 = arith.truncf %138 : vector<8x64xf32> to vector<8x64xbf16>
    %cst_65 = arith.constant dense<0.000000e+00> : vector<8x32xf32>
    %141 = tpu.matmul %140, %139, %cst_65 {dimension_numbers = #tpu.dot_dimension_numbers<[1], [0], [0], [1], [0, 0, 1, 1], [], []>} : vector<8x64xbf16>, vector<64x32xbf16>, vector<8x32xf32> -> vector<8x32xf32>
    %c9 = arith.constant 9 : index
    %c0_66 = arith.constant 0 : index
    %142 = vector.load %arg2[%c9, %c0_66] : memref<16x128xf32, #tpu.memory_space<vmem>>, vector<1x32xf32>
    %143 = vector.broadcast %142 : vector<1x32xf32> to vector<8x32xf32>
    %144 = arith.addf %141, %143 : vector<8x32xf32>
    %145 = arith.addf %100, %144 : vector<8x32xf32>
    %c112 = arith.constant 112 : index
    %c0_67 = arith.constant 0 : index
    %146 = vector.load %arg3[%c112, %c0_67] : memref<192x128xbf16, #tpu.memory_space<vmem>>, vector<32x32xbf16>
    %147 = arith.truncf %145 : vector<8x32xf32> to vector<8x32xbf16>
    %cst_68 = arith.constant dense<0.000000e+00> : vector<8x32xf32>
    %148 = tpu.matmul %147, %146, %cst_68 {dimension_numbers = #tpu.dot_dimension_numbers<[1], [0], [0], [1], [0, 0, 1, 1], [], []>} : vector<8x32xbf16>, vector<32x32xbf16>, vector<8x32xf32> -> vector<8x32xf32>
    %c10 = arith.constant 10 : index
    %c0_69 = arith.constant 0 : index
    %149 = vector.load %arg2[%c10, %c0_69] : memref<16x128xf32, #tpu.memory_space<vmem>>, vector<1x32xf32>
    %150 = vector.broadcast %149 : vector<1x32xf32> to vector<8x32xf32>
    %151 = arith.addf %148, %150 : vector<8x32xf32>
    %cst_70 = arith.constant 5.000000e-01 : f32
    %152 = vector.broadcast %cst_70 : f32 to vector<8x32xf32>
    %153 = arith.mulf %152, %151 : vector<8x32xf32>
    %cst_71 = arith.constant 0.707106769 : f32
    %154 = vector.broadcast %cst_71 : f32 to vector<8x32xf32>
    %155 = arith.mulf %151, %154 : vector<8x32xf32>
    %156 = math.erf %155 : vector<8x32xf32>
    %cst_72 = arith.constant 1.000000e+00 : f32
    %157 = vector.broadcast %cst_72 : f32 to vector<8x32xf32>
    %158 = arith.addf %157, %156 : vector<8x32xf32>
    %159 = arith.mulf %153, %158 : vector<8x32xf32>
    %cst_73 = arith.constant dense<0xFF800000> : vector<32xf32>
    %160 = vector.multi_reduction <maximumf>, %159, %cst_73 [0] : vector<8x32xf32> to vector<32xf32>
    %161 = vector.shape_cast %160 : vector<32xf32> to vector<1x32xf32>
    %cst_74 = arith.constant dense<0.000000e+00> : vector<1xf32>
    %162 = vector.multi_reduction <add>, %161, %cst_74 [1] : vector<1x32xf32> to vector<1xf32>
    %163 = vector.shape_cast %162 : vector<1xf32> to vector<1x1xf32>
    %cst_75 = arith.constant 3.200000e+01 : f32
    %164 = vector.broadcast %cst_75 : f32 to vector<1x1xf32>
    %165 = arith.divf %163, %164 : vector<1x1xf32>
    %166 = vector.broadcast %165 : vector<1x1xf32> to vector<1x32xf32>
    %167 = arith.subf %161, %166 : vector<1x32xf32>
    %168 = arith.mulf %167, %167 : vector<1x32xf32>
    %cst_76 = arith.constant dense<0.000000e+00> : vector<1xf32>
    %169 = vector.multi_reduction <add>, %168, %cst_76 [1] : vector<1x32xf32> to vector<1xf32>
    %170 = vector.shape_cast %169 : vector<1xf32> to vector<1x1xf32>
    %cst_77 = arith.constant 3.200000e+01 : f32
    %171 = vector.broadcast %cst_77 : f32 to vector<1x1xf32>
    %172 = arith.divf %170, %171 : vector<1x1xf32>
    %173 = vector.broadcast %165 : vector<1x1xf32> to vector<1x32xf32>
    %174 = arith.subf %161, %173 : vector<1x32xf32>
    %cst_78 = arith.constant 9.99999974E-6 : f32
    %175 = vector.broadcast %cst_78 : f32 to vector<1x1xf32>
    %176 = arith.addf %172, %175 : vector<1x1xf32>
    %177 = math.rsqrt %176 : vector<1x1xf32>
    %178 = vector.broadcast %177 : vector<1x1xf32> to vector<1x32xf32>
    %179 = arith.mulf %174, %178 : vector<1x32xf32>
    %c11 = arith.constant 11 : index
    %c0_79 = arith.constant 0 : index
    %180 = vector.load %arg2[%c11, %c0_79] : memref<16x128xf32, #tpu.memory_space<vmem>>, vector<1x32xf32>
    %181 = arith.mulf %179, %180 : vector<1x32xf32>
    %c12_80 = arith.constant 12 : index
    %c0_81 = arith.constant 0 : index
    %182 = vector.load %arg2[%c12_80, %c0_81] : memref<16x128xf32, #tpu.memory_space<vmem>>, vector<1x32xf32>
    %183 = arith.addf %181, %182 : vector<1x32xf32>
    %c144 = arith.constant 144 : index
    %c0_82 = arith.constant 0 : index
    %184 = vector.load %arg3[%c144, %c0_82] : memref<192x128xbf16, #tpu.memory_space<vmem>>, vector<32x16xbf16>
    %185 = arith.truncf %183 : vector<1x32xf32> to vector<1x32xbf16>
    %cst_83 = arith.constant dense<0.000000e+00> : vector<1x16xf32>
    %186 = tpu.matmul %185, %184, %cst_83 {dimension_numbers = #tpu.dot_dimension_numbers<[1], [0], [0], [1], [0, 0, 1, 1], [], []>} : vector<1x32xbf16>, vector<32x16xbf16>, vector<1x16xf32> -> vector<1x16xf32>
    %c13 = arith.constant 13 : index
    %c0_84 = arith.constant 0 : index
    %187 = vector.load %arg2[%c13, %c0_84] : memref<16x128xf32, #tpu.memory_space<vmem>>, vector<1x16xf32>
    %188 = arith.addf %186, %187 : vector<1x16xf32>
    %cst_85 = arith.constant 5.000000e-01 : f32
    %189 = vector.broadcast %cst_85 : f32 to vector<1x16xf32>
    %190 = arith.mulf %189, %188 : vector<1x16xf32>
    %cst_86 = arith.constant 0.707106769 : f32
    %191 = vector.broadcast %cst_86 : f32 to vector<1x16xf32>
    %192 = arith.mulf %188, %191 : vector<1x16xf32>
    %193 = math.erf %192 : vector<1x16xf32>
    %cst_87 = arith.constant 1.000000e+00 : f32
    %194 = vector.broadcast %cst_87 : f32 to vector<1x16xf32>
    %195 = arith.addf %194, %193 : vector<1x16xf32>
    %196 = arith.mulf %190, %195 : vector<1x16xf32>
    %c176 = arith.constant 176 : index
    %c0_88 = arith.constant 0 : index
    %197 = vector.load %arg3[%c176, %c0_88] : memref<192x128xbf16, #tpu.memory_space<vmem>>, vector<16x16xbf16>
    %198 = arith.truncf %196 : vector<1x16xf32> to vector<1x16xbf16>
    %cst_89 = arith.constant dense<0.000000e+00> : vector<1x16xf32>
    %199 = tpu.matmul %198, %197, %cst_89 {dimension_numbers = #tpu.dot_dimension_numbers<[1], [0], [0], [1], [0, 0, 1, 1], [], []>} : vector<1x16xbf16>, vector<16x16xbf16>, vector<1x16xf32> -> vector<1x16xf32>
    %c14 = arith.constant 14 : index
    %c0_90 = arith.constant 0 : index
    %200 = vector.load %arg2[%c14, %c0_90] : memref<16x128xf32, #tpu.memory_space<vmem>>, vector<1x16xf32>
    %201 = arith.addf %199, %200 : vector<1x16xf32>
    %202 = arith.mulf %201, %201 : vector<1x16xf32>
    %cst_91 = arith.constant dense<0.000000e+00> : vector<1xf32>
    %203 = vector.multi_reduction <add>, %202, %cst_91 [1] : vector<1x16xf32> to vector<1xf32>
    %204 = vector.shape_cast %203 : vector<1xf32> to vector<1x1xf32>
    %205 = math.rsqrt %204 : vector<1x1xf32>
    %206 = vector.broadcast %205 : vector<1x1xf32> to vector<1x16xf32>
    %207 = arith.mulf %201, %206 : vector<1x16xf32>
    %208 = vector.shape_cast %207 : vector<1x16xf32> to vector<1x1x16xf32>
    %c0_92 = arith.constant 0 : index
    %c0_93 = arith.constant 0 : index
    %c0_94 = arith.constant 0 : index
    %209 = vector.load %arg6[%c0_92, %c0_93, %c0_94] : memref<1x1x16xf32, #tpu.memory_space<vmem>>, vector<1x1x16xf32>
    tpu.vector_store %arg6[%c0_92, %c0_93, %c0_94], %208 {strides = array<i32>} : memref<1x1x16xf32, #tpu.memory_space<vmem>>, vector<1x1x16xf32>,
    return
  }
  func.func @transform_0(%arg0: i32) -> (i32, i32, i32) {
    %c0_i32 = arith.constant 0 : i32
    %c0_i32_0 = arith.constant 0 : i32
    %c0_i32_1 = arith.constant 0 : i32
    return %arg0, %c0_i32, %c0_i32_0 : i32, i32, i32
  }
  func.func @transform_1(%arg0: i32) -> (i32, i32) {
    %c0_i32 = arith.constant 0 : i32
    %c0_i32_0 = arith.constant 0 : i32
    %c0_i32_1 = arith.constant 0 : i32
    return %c0_i32, %c0_i32_0 : i32, i32
  }
  func.func @transform_2(%arg0: i32) -> (i32, i32) {
    %c0_i32 = arith.constant 0 : i32
    %c0_i32_0 = arith.constant 0 : i32
    %c0_i32_1 = arith.constant 0 : i32
    return %c0_i32, %c0_i32_0 : i32, i32
  }
  func.func @transform_3(%arg0: i32) -> (i32, i32, i32) {
    %c0_i32 = arith.constant 0 : i32
    %c0_i32_0 = arith.constant 0 : i32
    %c0_i32_1 = arith.constant 0 : i32
    %c0_i32_2 = arith.constant 0 : i32
    return %c0_i32, %c0_i32_0, %c0_i32_1 : i32, i32, i32
  }
  func.func @transform_4(%arg0: i32) -> (i32, i32, i32) {
    %c0_i32 = arith.constant 0 : i32
    %c0_i32_0 = arith.constant 0 : i32
    %c0_i32_1 = arith.constant 0 : i32
    %c0_i32_2 = arith.constant 0 : i32
    return %c0_i32, %c0_i32_0, %c0_i32_1 : i32, i32, i32
  }
  func.func @transform_5(%arg0: i32) -> (i32, i32, i32) {
    %c0_i32 = arith.constant 0 : i32
    %c0_i32_0 = arith.constant 0 : i32
    %c0_i32_1 = arith.constant 0 : i32
    return %arg0, %c0_i32, %c0_i32_0 : i32, i32, i32
  }
}

</mosaic_0001>

<bundles_post_ra>
// kernel: fwd.1
= control target key start
LH: loop header
LB: loop body
LE: loop exit
PB: predicated region body
PF: predicated region fallthrough
CT: control target
= control target key end

     0   :  { %10 = vsyncpa [#allocation3], 0  ;;  %s2646_s0 = inlined_call_operand.hbm [shape: f32[2,8,16], index: 0, kind: input, shape index: {}]   ;;  %s2647_s1 = inlined_call_operand.hbm [shape: f32[16,128], index: 1, kind: input, shape index: {}]   ;;  %s2648_s2 = inlined_call_operand.hbm [shape: bf16[192,128], index: 2, kind: input, shape index: {}]   ;;  %s2649_s3 = inlined_call_operand.hbm [shape: bf16[16,32,8], index: 3, kind: input, shape index: {}]   ;;  %s2650_s4 = inlined_call_operand.hbm [shape: f32[12,1,8], index: 4, kind: input, shape index: {}]   ;;  %s2651_s5 = inlined_call_operand.hbm [shape: f32[2,1,16], index: 5, kind: output, shape index: {}]  }
   0x1   :  { %12 = vsyncpa [#allocation3 + $0x1], 0 }
   0x2   :  { %13 = vsyncpa [#allocation6], 0 }
   0x3   :  { %14 = vsyncpa [#allocation9], 0 }
   0x4   :  { %15 = vsyncpa [#allocation4], 0 }
   0x5   :  { %17 = vsyncpa [#allocation4 + $0x1], 0  ;;  %s2392_s18 = smov 0   ;;  %s2394_s19 = smov 0  }
   0x6   :  { %s2396_s20 = smov 0   ;;  %s2398_s21 = smov 0  }
   0x7 LB: > { %s175_s24 = sshll.u32 %s2647_s1, 4  ;;  %s2416_s25 = sadd.s32 4294967295, %s2348_s21   ;;  %s2348_s21 = sphi %s2398_s21, %s2663_s21   ;;  %s2344_s20 = sphi %s2396_s20, %s2662_s20   ;;  %s2340_s19 = sphi %s2394_s19, %s2661_s19   ;;  %s2336_s18 = sphi %s2392_s18, %s2660_s18   ;;  %s176_s24 = int_to_ptr.hbm [resolvable:$true] %s175_s24 }
   0x8   : > { %p1701_p0 = scmp.ge.s32.totalorder %s2348_s21, 1  ;;  %p44_p1 = scmp.eq.s32.totalorder %s2416_s25, 0 }
   0x9   : > { %p164_p2 = scmp.lt.s32.totalorder %s2348_s21, 3  ;;  %s2350_s27 = smov [#allocation5]  }
   0xa   : > { %s177_s28 = sshll.u32 %s2350_s27, 4  ;;  %s203_s7 = sshll.u32 %s2649_s3, 4  ;;  %s178_s28 = int_to_ptr.vmem [resolvable:$true] %s177_s28  ;;  %s204_s7 = int_to_ptr.hbm [resolvable:$true] %s203_s7 }
   0xb   : > { %p2421_p3 = pnand %p1701_p0, %p164_p2  ;;  %s2351_s8 = smov 128  }
   0xc   : > { %s2352_s9 = smov 8   ;;  %s2353_s10 = smov [#allocation8]  }
   0xd   : > { %p1990_p4 = pneg %p2421_p3  ;;  %s205_s11 = sshll.u32 %s2353_s10, 4  ;;  %s206_s11 = int_to_ptr.vmem [resolvable:$true] %s205_s11 }
   0xe   : > { %s189_s14 = sshll.u32 %s2648_s2, 4  ;;  %s2354_s15 = smov 64   ;;  %s190_s14 = int_to_ptr.hbm [resolvable:$true] %s189_s14 }
   0xf   : > { %p2430_p6 = pnand %p1990_p4, %p44_p1  ;;  %s2355_s16 = smov 4  }
  0x10   : > { %s217_s23 = sshll.u32 %s2650_s4, 4  ;;  %s2358_s6 = smov 16   ;;  %s218_s23 = int_to_ptr.hbm [resolvable:$true] %s217_s23 }
  0x11   : > { %1993 = dma.hbm_to_vmem [thread:$0]  (!%p2430_p6), %s176_s24, 256, %s178_s28, [#allocation6], %s2351_s8, %s2351_s8, %s2352_s9  }
  0x12   : > { %1999 = dma.hbm_to_vmem [thread:$0]  (!%p2430_p6), %s204_s7, 4096, %s206_s11, [#allocation9], %s2354_s15, %s2354_s15, %s2355_s16  }
  0x13   : > { %s2356_s24 = smov [#allocation7]   ;;  %s2357_s28 = smov [#allocation10]  }
  0x14   : > { %s191_s27 = sshll.u32 %s2356_s24, 4  ;;  %s219_s30 = sshll.u32 %s2357_s28, 4  ;;  %s192_s27 = int_to_ptr.vmem [resolvable:$true] %s191_s27  ;;  %s220_s30 = int_to_ptr.vmem [resolvable:$true] %s219_s30 }
  0x15   : > { %1996 = dma.hbm_to_vmem [thread:$0]  (!%p2430_p6), %s190_s14, 1536, %s192_s27, [#allocation6], %s2354_s15, %s2354_s15, %s2355_s16  }
  0x16   : > { %s2359_s7 = smov 1   ;;  %s1700_s8 = sadd.s32 4294967294, %s2348_s21  }
  0x17   : > { %2002 = dma.hbm_to_vmem [thread:$0]  (!%p2430_p6), %s218_s23, 192, %s220_s30, [#allocation9], %s2358_s6, %s2358_s6, %s2359_s7  }
  0x18   : > { %s2453_s9 = sadd.s32 1, %s2348_s21   ;;  %s30_s11 = sadd.s32 1, %s2344_s20 }
  0x19   : > { %s27_s10 = ssub.s32 %s2348_s21, %s2453_s9  ;;  %p37_p8 = scmp.ne.s32.totalorder %s2344_s20, %s2340_s19 }
  0x1a   : > { %p28_p7 = scmp.eq.s32.totalorder %s27_s10, 0  ;;  %p38_p9 = scmp.eq.s32.totalorder %s2348_s21, 0 }
  0x1b   : > { %p43_p10 = scmp.ne.s32.totalorder %s2340_s19, %s2336_s18  ;;  %p151_p13 = scmp.eq.s32.totalorder %s2416_s25, 1 }
  0x1c   : > { %s2464_s12 = scalar_select %p28_p7, %s2344_s20, %s30_s11  }
  0x1d   : > { %p2466_p11 = por %p38_p9, %p37_p8  ;;  %p2472_p12 = por %p44_p1, %p43_p10 }
  0x1e   : > { %p157_p0 = scmp.eq.s32.totalorder %s1700_s8, 1  ;;  %p2015_p2 = scmp.lt.s32.totalorder %s2348_s21, 2 }
  0x1f   : > { %s233_s14 = sand.u32 1, %s2344_s20   ;;  %p2479_p4 = por %p151_p13, %p37_p8 }
  0x20   : > { %p2483_p6 = por %p157_p0, %p43_p10  ;;  %s1707_s17 = sshll.u32 %s233_s14, 3 }
  0x21   : > { %s1708_s22 = sshll.u32 %s2348_s21, 3  ;;  %s237_s28 = scalar_lea.vmem [#allocation2], %s1707_s17 }
  0x22   : > { %s241_s27 = scalar_lea.hbm %s2646_s0, %s1708_s22  ;;  %s245_s30 = sshll.u32 %s237_s28, 4  ;;  %s246_s30 = int_to_ptr.vmem [resolvable:$true] %s245_s30 }
  0x23   : > { %s243_s6 = sshll.u32 %s241_s27, 4  ;;  %p2493_p7 = pnand %p2015_p2, %p2466_p11  ;;  %s244_s6 = int_to_ptr.hbm [resolvable:$true] %s243_s6 }
  0x24   : > { %s234_s8 = scalar_lea.sflag [#allocation3], %s233_s14  ;;  %s2244_s10 = sshra.s32 %s244_s6, 4  ;;  %s2245_s10 = int_to_ptr.hbm [resolvable:$true] %s2244_s10 }
  0x25   : > { %s2246_s11 = scalar_lea.hbm %s2245_s10, 8  ;;  %p2248_p9 = pneg %p2493_p7 }
  0x26   : > { %p2247_p8 = scmp.ne.s32.totalorder %s2245_s10, %s2246_s11  ;;  %s2251_s23 = scalar_lea.hbm %s2646_s0, 16 }
  0x27   : > { %p2252_p11 = scmp.lt.s32.totalorder %s2245_s10, %s2646_s0  ;;  %p2253_p0 = scmp.lt.s32.totalorder %s2251_s23, %s2246_s11 }
  0x28   : > { %p2249_p10 = pnand %p2248_p9, %p2247_p8 }
  0x29   : > { %p2254_p2 = por %p2253_p0, %p2252_p11 }
  0x2a   : > { %p2250_p13 = pneg %p2249_p10 }
  0x2c   : > { %p2255_p5 = pnand %p2254_p2, %p2250_p13 }
  0x2e   : > { %2258 = shalt.err (!%p2255_p5)
}
  0x2f   : > { %2006 = dma.hbm_to_vmem [thread:$0]  (!%p2493_p7), %s244_s6, 128, %s246_s30, %s234_s8  }
  0x30   : > { %254 = sbr.rel (%p2421_p3) target bundleno = 3069 (0xbfd), region = 40  ;;  %s2510_s14 = sand.u32 (!%p2421_p3), 1, %s2340_s19  }
  0x31   : > { %s1710_s27 = sshll.u32 (!%p2421_p3), %s2510_s14, 3  ;;  %s257_s28 = scalar_lea.sflag (!%p2421_p3), [#allocation3], %s2510_s14 }
  0x32   : > { %s260_s17 = scalar_lea.vmem (!%p2421_p3), [#allocation2], %s1710_s27 }
  0x35   : > { %2319 = dma.done.wait (%p2472_p12), %s257_s28, 128  }
  0x36   : > { %2321 = vsyncadd (%p2472_p12), %s257_s28, 4294967168 }
  0x37   : > { %2323 = dma.done.wait (%p44_p1), [#allocation6], 1792  }
  0x38   : > { %2325 = vsyncadd (%p44_p1), [#allocation6], 4294965504 }
  0x39   : > { %2327 = dma.done.wait (%p44_p1), [#allocation9], 4288  }
  0x3a   : > { %2329 = vsyncadd (%p44_p1), [#allocation9], 4294963008  ;;  %vm309_vm0 = vcmask 130048   ;;  %v308_v0 = vld [vmem:[%s260_s17] sm:$0xff]  ;;  %v2360_v2 = vmov 16.0   ;;  %vm372_vm5 = vcmask 261120   ;;  %s1592_s30 = scalar_lea.hbm %s2651_s5, %s2416_s25 }
  0x3b   : > { %v310_v1 = vsel %vm309_vm0, %v308_v0, 0.0  ;;  %2088 = vrcp.f32 %v2360_v2  ;;  %v1926_v14 = vld [vmem:[#allocation7] sm:$0xff]  ;;  %v2065_v24 = vld [vmem:[#allocation5] ss:$0 sm:$0xff]  ;;  %v2066_v27 = vld [vmem:[#allocation5 + $0x1] ss:$0 sm:$0xff] }
  0x3c   : > { %311 = vadd.xlane.f32.xlu0 %v310_v1  ;;  %366 = vmatpush.bf16.msra.mxu0 %v1926_v14  ;;  %v2067_v31 = vld [vmem:[#allocation5 + $0x2] ss:$0 sm:$0xff]  ;;  %v2361_v36 = vmov 32.0   ;;  %v1928_v48 = vld [vmem:[#allocation8 + $0x8] sm:$0xff]  ;;  %v1930_v49 = vld [vmem:[#allocation8 + $0x18] sm:$0xff]  ;;  %vm820_vm10 = vcmask 64512  }
  0x3d   : > { %v1932_v50 = vld [vmem:[#allocation8 + $0x28] sm:$0xff]  ;;  %v1934_v51 = vld [vmem:[#allocation8 + $0x38] sm:$0xff]  ;;  %462 = vmatpush.bf16.msra.mxu1 %v1928_v48  ;;  %487 = vmatpush.bf16.msra.mxu2 %v1930_v49  ;;  %v1927_v52 = vld [vmem:[#allocation8] sm:$0xff]  ;;  %vm956_vm11 = vcmask 1043456   ;;  %s306_s6 = scalar_lea.vmem [#allocation11], %s2510_s14  ;;  %s1596_s8 = sshll.u32 %s1592_s30, 4  ;;  %s1597_s8 = int_to_ptr.hbm [resolvable:$true] %s1596_s8 }
  0x3e   : > { %512 = vmatpush.bf16.msra.mxu3 %v1932_v50  ;;  %v1929_v53 = vld [vmem:[#allocation8 + $0x10] sm:$0xff]  ;;  %v1931_v54 = vld [vmem:[#allocation8 + $0x20] sm:$0xff]  ;;  %v1936_v57 = vld [vmem:[#allocation8 + $0x48] sm:$0xff]  ;;  %s1594_s7 = sshll.u32 %s306_s6, 4  ;;  %s1584_s10 = scalar_lea.sflag [#allocation4], %s2510_s14  ;;  %s1595_s7 = int_to_ptr.vmem [resolvable:$true] %s1594_s7 }
  0x3f   : > { %v1933_v55 = vld [vmem:[#allocation8 + $0x30] sm:$0xff]  ;;  %v1938_v58 = vld [vmem:[#allocation8 + $0x58] sm:$0xff]  ;;  %v1940_v59 = vld [vmem:[#allocation8 + $0x68] sm:$0xff]  ;;  %s2288_s11 = sshra.s32 %s1597_s8, 4  ;;  %s2294_s24 = scalar_lea.hbm %s2651_s5, 2  ;;  %s2289_s11 = int_to_ptr.hbm [resolvable:$true] %s2288_s11 }
  0x40   : > { %537 = vmatpush.bf16.msrb.mxu0 %v1934_v51  ;;  %v1942_v61 = vld [vmem:[#allocation8 + $0x78] sm:$0xff]  ;;  %v1935_v62 = vld [vmem:[#allocation8 + $0x40] sm:$0xff]  ;;  %v1937_v63 = vld [vmem:[#allocation8 + $0x50] sm:$0xff]  ;;  %s2290_s22 = scalar_lea.hbm %s2289_s11, 1  ;;  %p2295_p12 = scmp.lt.s32.totalorder %s2289_s11, %s2651_s5 }
  0x41   : > { %v2089_v3 = vpop.eup %2088  ;;  %463 = vmatpush.bf16.msra.mxu1 %v1927_v52  ;;  %488 = vmatpush.bf16.msra.mxu2 %v1929_v53  ;;  %v1939_v1 = vld [vmem:[#allocation8 + $0x60] sm:$0xff]  ;;  %v1941_v2 = vld [vmem:[#allocation8 + $0x70] sm:$0xff]  ;;  %p2291_p1 = scmp.ne.s32.totalorder %s2289_s11, %s2290_s22  ;;  %p2296_p7 = scmp.lt.s32.totalorder %s2294_s24, %s2290_s22 }
  0x42   : > { %v314_v4 = vmul.f32 16.0, %v2089_v3  ;;  %vm318_vm1 = vweird.f32 %v2089_v3  ;;  %513 = vmatpush.bf16.msra.mxu3 %v1931_v54 }
  0x43   : > { %p2292_p3 = pnand %p2291_p1, %p2479_p4  ;;  %p2297_p8 = por %p2296_p7, %p2295_p12 }
  0x44   : > { %v315_v5 = vsub.f32 1.0, %v314_v4  ;;  %538 = vmatpush.bf16.msrb.mxu0 %v1933_v55  ;;  %v2072_v55 = vld [vmem:[#allocation10 + $0x1] ss:$0 sm:$0xff] }
  0x45   : > { %596 = vmatpush.bf16.msrb.mxu1 %v1936_v57  ;;  %621 = vmatpush.bf16.msrb.mxu2 %v1938_v58  ;;  %v2073_v58 = vld [vmem:[#allocation10 + $0x2] ss:$0 sm:$0xff]  ;;  %p2293_p5 = pneg %p2292_p3 }
  0x46   : > { %v316_v6 = vmul.f32 %v2089_v3, %v315_v5  ;;  %646 = vmatpush.bf16.msrb.mxu3 %v1940_v59 }
  0x47   : > { %p2298_p9 = pnand %p2297_p8, %p2293_p5 }
  0x48   : > { %v317_v7 = vadd.f32 %v2089_v3, %v316_v6 }
  0x49   : > { %597 = vmatpush.bf16.msrb.mxu1 %v1935_v62  ;;  %622 = vmatpush.bf16.msrb.mxu2 %v1937_v63 }
  0x4a   : > { %v319_v8 = vsel %vm318_vm1, %v2089_v3, %v317_v7  ;;  %647 = vmatpush.bf16.msrb.mxu3 %v1939_v1  ;;  %v2078_v1 = vld [vmem:[#allocation10 + $0x8] ss:$0 sm:$0xff] }
  0xaf   : > { %v312_v9 = vpop.xlane.xlu0 %311 }
  0xb0   : > { %v320_v10 = vmul.f32 %v319_v8, %v312_v9  ;;  %v2068_v9 = vld [vmem:[#allocation5 + $0x3] ss:$0 sm:$0xff] }
  0xb2   : > { %v321_v11 = vsub.f32 %v308_v0, %v320_v10 }
  0xb4   : > { %v322_v12 = vmul.f32 %v321_v11, %v321_v11 }
  0xb6   : > { %v323_v13 = vsel %vm309_vm0, %v322_v12, 0.0 }
  0xb7   : > { %324 = vadd.xlane.f32.xlu0 %v323_v13 }
 0x12a   : > { %v325_v15 = vpop.xlane.xlu0 %324 }
 0x12b   : > { %v326_v16 = vmul.f32 %v325_v15, %v319_v8 }
 0x12d   : > { %v327_v17 = vadd.f32 1e-05, %v326_v16  ;;  %v1944_v16 = vld [vmem:[#allocation8 + $0x88] sm:$0xff] }
 0x12f   : > { %2090 = vrsqrt.f32 %v327_v17  ;;  %vm334_vm3 = vweird.f32 %v327_v17 }
 0x130   : > { %2092 = vrcp.f32 %v2361_v36 }
 0x135   : > { %v2091_v18 = vpop.eup %2090 }
 0x136   : > { %v329_v19 = vmul.f32 %v2091_v18, %v327_v17  ;;  %vm335_vm2 = vweird.f32 %v2091_v18  ;;  %v2093_v37 = vpop.eup %2092  ;;  %v1946_v17 = vld [vmem:[#allocation8 + $0x98] sm:$0xff] }
 0x137   : > { %vm336_vm4 = vmor %vm334_vm3, %vm335_vm2  ;;  %v377_v38 = vmul.f32 32.0, %v2093_v37  ;;  %vm381_vm6 = vweird.f32 %v2093_v37 }
 0x138   : > { %v330_v20 = vmul.f32 %v2091_v18, %v329_v19  ;;  %v1950_v19 = vld [vmem:[#allocation8 + $0xb8] sm:$0xff] }
 0x139   : > { %v378_v39 = vsub.f32 1.0, %v377_v38 }
 0x13a   : > { %v331_v21 = vmul.f32 0.5, %v330_v20  ;;  %v1943_v20 = vld [vmem:[#allocation8 + $0x80] sm:$0xff] }
 0x13b   : > { %v379_v40 = vmul.f32 %v2093_v37, %v378_v39  ;;  %v2070_v39 = vld [vmem:[#allocation10] ss:$0 sm:$0xff] }
 0x13c   : > { %v332_v22 = vsub.f32 1.5, %v331_v21  ;;  %v1945_v21 = vld [vmem:[#allocation8 + $0x90] sm:$0xff] }
 0x13d   : > { %v380_v41 = vadd.f32 %v2093_v37, %v379_v40 }
 0x13e   : > { %v333_v23 = vmul.f32 %v2091_v18, %v332_v22  ;;  %v1947_v22 = vld [vmem:[#allocation8 + $0xa0] sm:$0xff] }
 0x13f   : > { %v2533_v42 = vsel %vm381_vm6, %v2093_v37, %v380_v41  ;;  %v2076_v41 = vld [vmem:[#allocation10 + $0x5] ss:$0 sm:$0xff] }
 0x140   : > { %v337_v25 = vsel %vm336_vm4, %v2091_v18, %v333_v23  ;;  %v1948_v18 = vld [vmem:[#allocation8 + $0xa8] sm:$0xff]  ;;  %v1949_v23 = vld [vmem:[#allocation8 + $0xb0] sm:$0xff]  ;;  %vm1332_vm4 = vcmask 523264  }
 0x141   : > { %v338_v26 = vmul.f32 %v337_v25, %v321_v11  ;;  %v2069_v11 = vld [vmem:[#allocation5 + $0x4] ss:$0 sm:$0xff] }
 0x143   : > { %v341_v28 = vmul.f32 %v2065_v24, %v338_v26 }
 0x145   : > { %v344_v29 = vadd.f32 %v2066_v27, %v341_v28 }
 0x147   : > { %v347_v30 = vpack.c.bf16 %v344_v29, %v344_v29 }
 0x149   : > { %1719 = vmatmul.msk.bf16.vlgmr.msra.gmra.mxu0 %vm309_vm0, %v347_v30  ;;  %v2074_v30 = vld [vmem:[#allocation10 + $0x4] ss:$0 sm:$0xff] }
 0x14a   : > { %671 = vmatpush.bf16.msra.mxu0 %v1942_v61 }
 0x14e   : > { %672 = vmatpush.bf16.msra.mxu0 %v1941_v2 }
 0x1c6   : > { %v368_v32 = vpop.f32.mrf.mxu0 }
 0x1c7   : > { %v2529_v33 = vadd.f32 %v2067_v31, %v368_v32  ;;  %v2075_v32 = vld [vmem:[#allocation10 + $0x7] ss:$0 sm:$0xff] }
 0x1c9   : > { %v373_v34 = vsel %vm372_vm5, %v2529_v33, 0.0 }
 0x1ca   : > { %374 = vadd.xlane.f32.xlu1 %v373_v34 }
 0x1ce   : > { %v370_v35 = vpop.f32.mrf.mxu0 }
 0x23d   : > { %v375_v43 = vpop.xlane.xlu1 %374 }
 0x23e   : > { %v383_v44 = vmul.f32 %v2533_v42, %v375_v43  ;;  %v2071_v43 = vld [vmem:[#allocation10 + $0x3] ss:$0 sm:$0xff] }
 0x240   : > { %v384_v45 = vsub.f32 %v2529_v33, %v383_v44 }
 0x242   : > { %v385_v46 = vmul.f32 %v384_v45, %v384_v45 }
 0x244   : > { %v386_v47 = vsel %vm372_vm5, %v385_v46, 0.0 }
 0x245   : > { %387 = vadd.xlane.f32.xlu1 %v386_v47 }
 0x2b8   : > { %v388_v56 = vpop.xlane.xlu1 %387 }
 0x2b9   : > { %v389_v60 = vmul.f32 %v388_v56, %v2533_v42 }
 0x2bb   : > { %v390_v0 = vadd.f32 1e-05, %v389_v60 }
 0x2bd   : > { %2094 = vrsqrt.f32 %v390_v0  ;;  %vm397_vm8 = vweird.f32 %v390_v0 }
 0x2c3   : > { %v2095_v3 = vpop.eup %2094 }
 0x2c4   : > { %v392_v4 = vmul.f32 %v2095_v3, %v390_v0  ;;  %vm398_vm7 = vweird.f32 %v2095_v3 }
 0x2c5   : > { %vm399_vm9 = vmor %vm397_vm8, %vm398_vm7 }
 0x2c6   : > { %v393_v5 = vmul.f32 %v2095_v3, %v392_v4  ;;  %v2079_v4 = vld [vmem:[#allocation10 + $0xb] ss:$0 sm:$0xff] }
 0x2c8   : > { %v394_v6 = vmul.f32 0.5, %v393_v5 }
 0x2ca   : > { %v395_v7 = vsub.f32 1.5, %v394_v6 }
 0x2cc   : > { %v396_v8 = vmul.f32 %v2095_v3, %v395_v7 }
 0x2ce   : > { %v400_v10 = vsel %vm399_vm9, %v2095_v3, %v396_v8 }
 0x2cf   : > { %v401_v12 = vmul.f32 %v400_v10, %v384_v45  ;;  %v2077_v45 = vld [vmem:[#allocation10 + $0x6] ss:$0 sm:$0xff] }
 0x2d1   : > { %v404_v13 = vmul.f32 %v2068_v9, %v401_v12 }
 0x2d3   : > { %v407_v14 = vadd.f32 %v2069_v11, %v404_v13  ;;  %v2080_v13 = vld [vmem:[#allocation10 + $0x9] ss:$0 sm:$0xff] }
 0x2d5   : > { %v408_v15 = vpack.c.bf16 %v407_v14, %v407_v14 }
 0x2d7   : > { %1728 = vmatmul.msk.bf16.vlgmr.msra.gmra.mxu1 %vm372_vm5, %v408_v15  ;;  %1737 = vmatmul.msk.bf16.vlgmr.msra.gmra.mxu2 %vm372_vm5, %v408_v15 }
 0x2d8   : > { %1746 = vmatmul.msk.bf16.vlgmr.msra.gmra.mxu3 %vm372_vm5, %v408_v15  ;;  %1755 = vmatmul.msk.bf16.vlgmr.msrb.gmra.mxu0 %vm372_vm5, %v408_v15 }
 0x2d9   : > { %730 = vmatpush.bf16.msra.mxu1 %v1944_v16  ;;  %755 = vmatpush.bf16.msra.mxu2 %v1946_v17 }
 0x2da   : > { %780 = vmatpush.bf16.msra.mxu3 %v1948_v18  ;;  %805 = vmatpush.bf16.msrb.mxu0 %v1950_v19 }
 0x2dd   : > { %731 = vmatpush.bf16.msra.mxu1 %v1943_v20  ;;  %756 = vmatpush.bf16.msra.mxu2 %v1945_v21 }
 0x2de   : > { %781 = vmatpush.bf16.msra.mxu3 %v1947_v22  ;;  %806 = vmatpush.bf16.msrb.mxu0 %v1949_v23 }
 0x2e7   : > { %1764 = vmatmul.msk.bf16.vlgmr.msrb.gmra.mxu1 %vm372_vm5, %v408_v15  ;;  %1773 = vmatmul.msk.bf16.vlgmr.msrb.gmra.mxu2 %vm372_vm5, %v408_v15 }
 0x2e8   : > { %1782 = vmatmul.msk.bf16.vlgmr.msrb.gmra.mxu3 %vm372_vm5, %v408_v15  ;;  %1791 = vmatmul.msk.bf16.vlgmr.msra.gmra.mxu0 %vm372_vm5, %v408_v15 }
 0x2f7   : > { %1800 = vmatmul.msk.bf16.vlgmr.msra.gmra.mxu1 %vm372_vm5, %v408_v15  ;;  %1809 = vmatmul.msk.bf16.vlgmr.msra.gmra.mxu2 %vm372_vm5, %v408_v15 }
 0x2f8   : > { %1818 = vmatmul.msk.bf16.vlgmr.msra.gmra.mxu3 %vm372_vm5, %v408_v15  ;;  %1827 = vmatmul.msk.bf16.vlgmr.msrb.gmra.mxu0 %vm372_vm5, %v408_v15  ;;  %v2081_v15 = vld [vmem:[#allocation10 + $0xa] ss:$0 sm:$0xff] }
 0x354   : > { %v465_v24 = vpop.f32.mrf.mxu1 }
 0x355   : > { %v540_v25 = vpop.f32.mrf.mxu0  ;;  %v466_v49 = vadd.f32 %v2070_v39, %v465_v24 }
 0x356   : > { %v541_v52 = vadd.f32 %v2071_v43, %v540_v25 }
 0x357   : > { %v812_v60 = vpack.c.bf16 %v466_v49, %v466_v49 }
 0x358   : > { %v815_v62 = vpack.c.bf16 %v541_v52, %v541_v52 }
 0x35a   : > { %v490_v26 = vpop.f32.mrf.mxu2 }
 0x35b   : > { %v515_v27 = vpop.f32.mrf.mxu3  ;;  %v491_v0 = vadd.f32 %v2072_v55, %v490_v26 }
 0x35c   : > { %v467_v28 = vpop.f32.mrf.mxu1  ;;  %v516_v2 = vadd.f32 %v2073_v58, %v515_v27 }
 0x35d   : > { %v542_v29 = vpop.f32.mrf.mxu0  ;;  %v813_v7 = vpack.c.bf16 %v491_v0, %v491_v0 }
 0x35e   : > { %v814_v10 = vpack.c.bf16 %v516_v2, %v516_v2 }
 0x362   : > { %v492_v31 = vpop.f32.mrf.mxu2 }
 0x363   : > { %v517_v34 = vpop.f32.mrf.mxu3 }
 0x364   : > { %v599_v35 = vpop.f32.mrf.mxu1 }
 0x365   : > { %v600_v36 = vadd.f32 %v2074_v30, %v599_v35  ;;  %v674_v37 = vpop.f32.mrf.mxu0 }
 0x366   : > { %v675_v38 = vadd.f32 %v2075_v32, %v674_v37 }
 0x367   : > { %v816_v40 = vpack.c.bf16 %v600_v36, %v600_v36 }
 0x368   : > { %v819_v44 = vpack.c.bf16 %v675_v38, %v675_v38 }
 0x369   : > { %v825_v46 = vsel %vm820_vm10, %v816_v40, 0 }
 0x36a   : > { %v882_v47 = vsel %vm820_vm10, %v819_v44, 0  ;;  %v624_v48 = vpop.f32.mrf.mxu2  ;;  %834 = vmatpush.bf16.xpose.msrb.mxu1 %v825_v46 }
 0x36b   : > { %v625_v50 = vadd.f32 %v2076_v41, %v624_v48  ;;  %v649_v51 = vpop.f32.mrf.mxu3  ;;  %891 = vmatpush.bf16.xpose.msra.mxu0 %v882_v47 }
 0x36c   : > { %v650_v53 = vadd.f32 %v2077_v45, %v649_v51  ;;  %v601_v54 = vpop.f32.mrf.mxu1 }
 0x36d   : > { %v817_v56 = vpack.c.bf16 %v625_v50, %v625_v50  ;;  %v676_v57 = vpop.f32.mrf.mxu0 }
 0x36e   : > { %v818_v59 = vpack.c.bf16 %v650_v53, %v650_v53 }
 0x36f   : > { %v844_v61 = vsel %vm820_vm10, %v817_v56, 0 }
 0x370   : > { %v863_v63 = vsel %vm820_vm10, %v818_v59, 0  ;;  %853 = vmatpush.bf16.xpose.msrb.mxu2 %v844_v61 }
 0x371   : > { %872 = vmatpush.bf16.xpose.msrb.mxu3 %v863_v63  ;;  %1828 = vmatmul.msk.bf16.vlgmr.msrb.gmra.mxu1 %vm820_vm10, %v812_v60 }
 0x372   : > { %1831 = vmatmul.msk.bf16.vlgmr.msra.gmra.mxu0 %vm820_vm10, %v815_v62  ;;  %v626_v3 = vpop.f32.mrf.mxu2 }
 0x373   : > { %v651_v5 = vpop.f32.mrf.mxu3 }
 0x374   : > { %v733_v6 = vpop.f32.mrf.mxu1  ;;  %v1952_v5 = vld [vmem:[#allocation8 + $0xc8] sm:$0xff] }
 0x375   : > { %v734_v8 = vadd.f32 %v2078_v1, %v733_v6  ;;  %v808_v9 = vpop.f32.mrf.mxu0  ;;  %v1068_v6 = vsel %vm820_vm10, %v1952_v5, 0 }
 0x376   : > { %v809_v11 = vadd.f32 %v2079_v4, %v808_v9 }
 0x377   : > { %v949_v12 = vpack.c.bf16 %v734_v8, %v734_v8  ;;  %1829 = vmatmul.msk.bf16.vlgmr.msrb.gmra.mxu2 %vm820_vm10, %v813_v7  ;;  %v1951_v7 = vld [vmem:[#allocation8 + $0xc0] sm:$0xff] }
 0x378   : > { %v952_v14 = vpack.c.bf16 %v809_v11, %v809_v11  ;;  %1830 = vmatmul.msk.bf16.vlgmr.msrb.gmra.mxu3 %vm820_vm10, %v814_v10  ;;  %v1065_v11 = vsel %vm820_vm10, %v1951_v7, 0 }
 0x379   : > { %v958_v16 = vsel %vm956_vm11, %v949_v12, 0 }
 0x37a   : > { %v1015_v17 = vsel %vm956_vm11, %v952_v14, 0  ;;  %v758_v18 = vpop.f32.mrf.mxu2  ;;  %967 = vmatpush.bf16.msra.mxu1 %v958_v16 }
 0x37b   : > { %v759_v19 = vadd.f32 %v2080_v13, %v758_v18  ;;  %v783_v20 = vpop.f32.mrf.mxu3  ;;  %1024 = vmatpush.bf16.msrb.mxu0 %v1015_v17 }
 0x37c   : > { %v784_v21 = vadd.f32 %v2081_v15, %v783_v20  ;;  %v735_v22 = vpop.f32.mrf.mxu1 }
 0x37d   : > { %v950_v23 = vpack.c.bf16 %v759_v19, %v759_v19  ;;  %v810_v24 = vpop.f32.mrf.mxu0 }
 0x37e   : > { %v951_v25 = vpack.c.bf16 %v784_v21, %v784_v21  ;;  %1076 = vmatpush.bf16.xpose.msrb.mxu1 %v1068_v6  ;;  %v1954_v24 = vld [vmem:[#allocation8 + $0xd8] sm:$0xff] }
 0x37f   : > { %v977_v26 = vsel %vm956_vm11, %v950_v23, 0 }
 0x380   : > { %v996_v27 = vsel %vm956_vm11, %v951_v25, 0  ;;  %986 = vmatpush.bf16.msra.mxu2 %v977_v26  ;;  %v1100_v25 = vsel %vm820_vm10, %v1954_v24, 0  ;;  %v1958_v26 = vld [vmem:[#allocation8 + $0xf8] sm:$0xff] }
 0x381   : > { %1005 = vmatpush.bf16.msra.mxu3 %v996_v27  ;;  %v1164_v27 = vsel %vm820_vm10, %v1958_v26, 0 }
 0x382   : > { %v760_v28 = vpop.f32.mrf.mxu2  ;;  %1172 = vmatpush.bf16.xpose.msra.mxu0 %v1164_v27  ;;  %v2085_v27 = vld [vmem:[#allocation5 + $0x8] ss:$0 sm:$0xff] }
 0x383   : > { %v785_v29 = vpop.f32.mrf.mxu3  ;;  %v1953_v28 = vld [vmem:[#allocation8 + $0xd0] sm:$0xff] }
 0x384   : > { %1108 = vmatpush.bf16.xpose.msrb.mxu2 %v1100_v25  ;;  %v1956_v29 = vld [vmem:[#allocation8 + $0xe8] sm:$0xff] }
 0x386   : > { %1077 = vmatpush.bf16.xpose.msrb.mxu1 %v1065_v11  ;;  %v1959_v11 = vld [vmem:[#allocation7 + $0x8] sm:$0xff] }
 0x3ee   : > { %v836_v30 = vpop.f32.mrf.mxu1 }
 0x3ef   : > { %v897_v31 = vmul.f32 0.35355338, %v836_v30  ;;  %v893_v32 = vpop.f32.mrf.mxu0  ;;  %v1132_v30 = vsel %vm820_vm10, %v1956_v29, 0 }
 0x3f0   : > { %v900_v34 = vmul.f32 0.35355338, %v893_v32  ;;  %v1097_v32 = vsel %vm820_vm10, %v1953_v28, 0  ;;  %1140 = vmatpush.bf16.xpose.msrb.mxu3 %v1132_v30 }
 0x3f1   : > { %v901_v35 = vsel %vm820_vm10, %v897_v31, -inf  ;;  %1109 = vmatpush.bf16.xpose.msrb.mxu2 %v1097_v32 }
 0x3f2   : > { %v910_v36 = vsel %vm820_vm10, %v900_v34, -inf  ;;  %902 = vmax.xlane.f32.xlu0 %v901_v35  ;;  %v1955_v35 = vld [vmem:[#allocation8 + $0xe0] sm:$0xff] }
 0x3f3   : > { %911 = vmax.xlane.f32.xlu1 %v910_v36  ;;  %v1129_v36 = vsel %vm820_vm10, %v1955_v35, 0  ;;  %v1964_v35 = vld [vmem:[#allocation7 + $0x30] sm:$0xff] }
 0x3f6   : > { %v838_v37 = vpop.f32.mrf.mxu1 }
 0x3f7   : > { %v895_v38 = vpop.f32.mrf.mxu0 }
 0x3f8   : > { %1141 = vmatpush.bf16.xpose.msrb.mxu3 %v1129_v36 }
 0x3fa   : > { %v855_v39 = vpop.f32.mrf.mxu2 }
 0x3fb   : > { %v898_v40 = vmul.f32 0.35355338, %v855_v39  ;;  %v874_v41 = vpop.f32.mrf.mxu3 }
 0x3fc   : > { %v899_v44 = vmul.f32 0.35355338, %v874_v41 }
 0x3fd   : > { %v904_v43 = vsel %vm820_vm10, %v898_v40, -inf }
 0x3fe   : > { %905 = vmax.xlane.f32.xlu2 %v904_v43  ;;  %v907_v47 = vsel %vm820_vm10, %v899_v44, -inf }
 0x402   : > { %v857_v45 = vpop.f32.mrf.mxu2 }
 0x403   : > { %v876_v46 = vpop.f32.mrf.mxu3 }
 0x406   : > { %908 = vmax.xlane.f32.xlu2 %v907_v47 }
 0x465   : > { %v903_v48 = vpop.xlane.xlu0 %902 }
 0x466   : > { %v913_v49 = vsub.f32 %v897_v31, %v903_v48  ;;  %v912_v52 = vpop.xlane.xlu1 %911  ;;  %v1957_v31 = vld [vmem:[#allocation8 + $0xf0] sm:$0xff] }
 0x467   : > { %v916_v56 = vsub.f32 %v900_v34, %v912_v52  ;;  %v1161_v34 = vsel %vm820_vm10, %v1957_v31, 0 }
 0x468   : > { %v917_v50 = vmul.f32 1.442695, %v913_v49  ;;  %1173 = vmatpush.bf16.xpose.msra.mxu0 %v1161_v34 }
 0x469   : > { %v923_v58 = vmul.f32 1.442695, %v916_v56 }
 0x46a   : > { %2096 = vpow2.f32 %v917_v50 }
 0x470   : > { %v2097_v51 = vpop.eup %2096 }
 0x471   : > { %v906_v53 = vpop.xlane.xlu2 %905  ;;  %v925_v54 = vsel %vm820_vm10, %v2097_v51, 0.0 }
 0x472   : > { %v914_v55 = vsub.f32 %v898_v40, %v906_v53  ;;  %926 = vadd.xlane.f32.xlu1 %v925_v54 }
 0x474   : > { %v919_v57 = vmul.f32 1.442695, %v914_v55 }
 0x476   : > { %2098 = vpow2.f32 %v919_v57 }
 0x477   : > { %2100 = vpow2.f32 %v923_v58 }
 0x479   : > { %v909_v59 = vpop.xlane.xlu2 %908 }
 0x47a   : > { %v915_v60 = vsub.f32 %v899_v44, %v909_v59 }
 0x47c   : > { %v2099_v61 = vpop.eup %2098  ;;  %v921_v62 = vmul.f32 1.442695, %v915_v60 }
 0x47d   : > { %v928_v63 = vsel %vm820_vm10, %v2099_v61, 0.0  ;;  %v2101_v0 = vpop.eup %2100 }
 0x47e   : > { %2102 = vpow2.f32 %v921_v62  ;;  %929 = vadd.xlane.f32.xlu2 %v928_v63  ;;  %v934_v2 = vsel %vm820_vm10, %v2101_v0, 0.0  ;;  %v2082_v62 = vld [vmem:[#allocation5 + $0x5] ss:$0 sm:$0xff] }
 0x484   : > { %v2103_v1 = vpop.eup %2102 }
 0x485   : > { %v931_v3 = vsel %vm820_vm10, %v2103_v1, 0.0 }
 0x486   : > { %935 = vadd.xlane.f32.xlu2 %v934_v2  ;;  %932 = vadd.xlane.f32.xlu0 %v931_v3 }
 0x4e5   : > { %v927_v4 = vpop.xlane.xlu1 %926 }
 0x4e6   : > { %2104 = vrcp.f32 %v927_v4 }
 0x4ec   : > { %v2105_v8 = vpop.eup %2104 }
 0x4ed   : > { %v941_v9 = vmul.f32 %v2105_v8, %v2097_v51 }
 0x4ef   : > { %v945_v10 = vpack.c.bf16 %v941_v9, %v941_v9 }
 0x4f1   : > { %v930_v12 = vpop.xlane.xlu2 %929  ;;  %1832 = vmatmul.msk.bf16.vlgmr.msra.gmra.mxu1 %vm820_vm10, %v945_v10  ;;  %v1960_v10 = vld [vmem:[#allocation7 + $0x10] sm:$0xff] }
 0x4f2   : > { %2106 = vrcp.f32 %v930_v12  ;;  %1246 = vmatpush.bf16.msra.mxu1 %v1960_v10 }
 0x4f6   : > { %1247 = vmatpush.bf16.msra.mxu1 %v1959_v11 }
 0x4f8   : > { %v2107_v13 = vpop.eup %2106 }
 0x4f9   : > { %v942_v14 = vmul.f32 %v2107_v13, %v2099_v61  ;;  %v936_v15 = vpop.xlane.xlu2 %935  ;;  %v933_v16 = vpop.xlane.xlu0 %932 }
 0x4fa   : > { %2108 = vrcp.f32 %v936_v15 }
 0x4fb   : > { %v946_v17 = vpack.c.bf16 %v942_v14, %v942_v14  ;;  %2110 = vrcp.f32 %v933_v16 }
 0x4fd   : > { %1833 = vmatmul.msk.bf16.vlgmr.msra.gmra.mxu2 %vm820_vm10, %v946_v17 }
 0x4fe   : > { %1340 = vmatpush.bf16.msra.mxu2 %v1964_v35 }
 0x500   : > { %v2109_v18 = vpop.eup %2108 }
 0x501   : > { %v2111_v19 = vpop.eup %2110  ;;  %v944_v20 = vmul.f32 %v2109_v18, %v2101_v0 }
 0x502   : > { %v943_v21 = vmul.f32 %v2111_v19, %v2103_v1 }
 0x503   : > { %v948_v22 = vpack.c.bf16 %v944_v20, %v944_v20  ;;  %v2083_v20 = vld [vmem:[#allocation5 + $0x6] ss:$0 sm:$0xff] }
 0x504   : > { %v947_v23 = vpack.c.bf16 %v943_v21, %v943_v21 }
 0x505   : > { %1835 = vmatmul.msk.bf16.vlgmr.msrb.gmra.mxu0 %vm820_vm10, %v948_v22 }
 0x506   : > { %1834 = vmatmul.msk.bf16.vlgmr.msra.gmra.mxu3 %vm820_vm10, %v947_v23  ;;  %v2084_v23 = vld [vmem:[#allocation5 + $0x7] ss:$0 sm:$0xff] }
 0x56e   : > { %v969_v37 = vpop.f32.mrf.mxu1 }
 0x56f   : > { %v1030_v38 = vpack.c.bf16 %v969_v37, %v969_v37 }
 0x571   : > { %1844 = vmatmul.msk.bf16.vlgmr.msrb.gmra.mxu1 %vm820_vm10, %v1030_v38 }
 0x576   : > { %v971_v39 = vpop.f32.mrf.mxu1 }
 0x580   : > { %v988_v40 = vpop.f32.mrf.mxu2 }
 0x581   : > { %v1031_v41 = vpack.c.bf16 %v988_v40, %v988_v40  ;;  %v1963_v40 = vld [vmem:[#allocation7 + $0x28] sm:$0xff] }
 0x582   : > { %v1026_v43 = vpop.f32.mrf.mxu0  ;;  %1341 = vmatpush.bf16.msra.mxu2 %v1963_v40 }
 0x583   : > { %v1033_v44 = vpack.c.bf16 %v1026_v43, %v1026_v43  ;;  %1853 = vmatmul.msk.bf16.vlgmr.msrb.gmra.mxu2 %vm820_vm10, %v1031_v41 }
 0x585   : > { %1871 = vmatmul.msk.bf16.vlgmr.msra.gmra.mxu0 %vm820_vm10, %v1033_v44 }
 0x588   : > { %v990_v45 = vpop.f32.mrf.mxu2 }
 0x589   : > { %v1007_v46 = vpop.f32.mrf.mxu3 }
 0x58a   : > { %v1032_v47 = vpack.c.bf16 %v1007_v46, %v1007_v46  ;;  %v1028_v48 = vpop.f32.mrf.mxu0  ;;  %v1962_v46 = vld [vmem:[#allocation7 + $0x20] sm:$0xff] }
 0x58b   : > { %1342 = vmatpush.bf16.msra.mxu2 %v1962_v46 }
 0x58c   : > { %1862 = vmatmul.msk.bf16.vlgmr.msrb.gmra.mxu3 %vm820_vm10, %v1032_v47 }
 0x591   : > { %v1009_v49 = vpop.f32.mrf.mxu3 }
 0x5ee   : > { %v1079_v50 = vpop.f32.mrf.mxu1 }
 0x5ef   : > { %v1179_v56 = vsel %vm372_vm5, %v1079_v50, 0.0  ;;  %v1961_v50 = vld [vmem:[#allocation7 + $0x18] sm:$0xff] }
 0x5f0   : > { %1343 = vmatpush.bf16.msra.mxu2 %v1961_v50 }
 0x5f6   : > { %v1081_v51 = vpop.f32.mrf.mxu1 }
 0x602   : > { %v1175_v52 = vpop.f32.mrf.mxu0 }
 0x603   : > { %v1184_v63 = vsel %vm372_vm5, %v1175_v52, 0.0 }
 0x606   : > { %v1111_v53 = vpop.f32.mrf.mxu2 }
 0x607   : > { %v1180_v55 = vsel %vm372_vm5, %v1111_v53, 0.0 }
 0x608   : > { %v1181_v58 = vadd.f32 %v1180_v55, %v1179_v56 }
 0x60a   : > { %v1177_v54 = vpop.f32.mrf.mxu0 }
 0x60e   : > { %v1113_v57 = vpop.f32.mrf.mxu2 }
 0x60f   : > { %v1143_v59 = vpop.f32.mrf.mxu3 }
 0x610   : > { %v1182_v60 = vsel %vm372_vm5, %v1143_v59, 0.0 }
 0x611   : > { %v1183_v61 = vadd.f32 %v1182_v60, %v1181_v58 }
 0x613   : > { %v1185_v0 = vadd.f32 %v1184_v63, %v1183_v61 }
 0x615   : > { %v1188_v1 = vadd.f32 %v2082_v62, %v1185_v0 }
 0x617   : > { %v1145_v2 = vpop.f32.mrf.mxu3  ;;  %v2592_v3 = vadd.f32 %v1188_v1, %v2529_v33 }
 0x619   : > { %v1190_v4 = vsel %vm372_vm5, %v2592_v3, 0.0 }
 0x61a   : > { %1191 = vadd.xlane.f32.xlu0 %v1190_v4 }
 0x68d   : > { %v1192_v5 = vpop.xlane.xlu0 %1191 }
 0x68e   : > { %v1193_v6 = vmul.f32 %v1192_v5, %v2533_v42 }
 0x690   : > { %v1194_v7 = vsub.f32 %v2592_v3, %v1193_v6 }
 0x692   : > { %v1195_v8 = vmul.f32 %v1194_v7, %v1194_v7 }
 0x694   : > { %v1196_v9 = vsel %vm372_vm5, %v1195_v8, 0.0 }
 0x695   : > { %1197 = vadd.xlane.f32.xlu1 %v1196_v9 }
 0x708   : > { %v1198_v12 = vpop.xlane.xlu1 %1197 }
 0x709   : > { %v1199_v33 = vmul.f32 %v1198_v12, %v2533_v42 }
 0x70b   : > { %v1200_v13 = vadd.f32 1e-05, %v1199_v33 }
 0x70d   : > { %2112 = vrsqrt.f32 %v1200_v13  ;;  %vm1207_vm13 = vweird.f32 %v1200_v13 }
 0x713   : > { %v2113_v14 = vpop.eup %2112 }
 0x714   : > { %v1202_v15 = vmul.f32 %v2113_v14, %v1200_v13  ;;  %vm1208_vm12 = vweird.f32 %v2113_v14  ;;  %v1966_v13 = vld [vmem:[#allocation7 + $0x40] sm:$0xff] }
 0x715   : > { %vm1209_vm14 = vmor %vm1207_vm13, %vm1208_vm12  ;;  %1378 = vmatpush.bf16.msra.mxu3 %v1966_v13 }
 0x716   : > { %v1203_v16 = vmul.f32 %v2113_v14, %v1202_v15  ;;  %v2086_v15 = vld [vmem:[#allocation5 + $0x9] ss:$0 sm:$0xff] }
 0x718   : > { %v1204_v17 = vmul.f32 0.5, %v1203_v16 }
 0x71a   : > { %v1205_v18 = vsub.f32 1.5, %v1204_v17 }
 0x71c   : > { %v1206_v19 = vmul.f32 %v2113_v14, %v1205_v18 }
 0x71e   : > { %v1210_v21 = vsel %vm1209_vm14, %v2113_v14, %v1206_v19  ;;  %v1965_v14 = vld [vmem:[#allocation7 + $0x38] sm:$0xff] }
 0x71f   : > { %v1211_v22 = vmul.f32 %v1210_v21, %v1194_v7  ;;  %1379 = vmatpush.bf16.msra.mxu3 %v1965_v14  ;;  %v2087_v21 = vld [vmem:[#allocation5 + $0xa] ss:$0 sm:$0xff]  ;;  %v1968_v14 = vld [vmem:[#allocation7 + $0x50] sm:$0xff] }
 0x720   : > { %1489 = vmatpush.bf16.msrb.mxu0 %v1968_v14 }
 0x721   : > { %v1214_v24 = vmul.f32 %v2083_v20, %v1211_v22 }
 0x723   : > { %v1217_v25 = vadd.f32 %v2084_v23, %v1214_v24 }
 0x725   : > { %v1222_v26 = vpack.c.bf16 %v1217_v25, %v1217_v25 }
 0x727   : > { %1880 = vmatmul.msk.bf16.vlgmr.msra.gmra.mxu1 %vm372_vm5, %v1222_v26 }
 0x7a4   : > { %v1249_v28 = vpop.f32.mrf.mxu1 }
 0x7a5   : > { %v1250_v29 = vadd.f32 %v2085_v27, %v1249_v28 }
 0x7a7   : > { %v1254_v30 = vmul.f32 0.70710677, %v1250_v29  ;;  %v1253_v10 = vmul.f32 0.5, %v1250_v29 }
 0x7a9   : > { %v1255_v31 = vmul.f32 %v1254_v30, %v1254_v30 }
 0x7ab   : > { %v1256_v32 = vmin.f32 %v1255_v31, 16.0 }
 0x7ac   : > { %v1251_v34 = vpop.f32.mrf.mxu1 }
 0x7ad   : > { %v1257_v36 = vmul.f32 2.1237322e-06, %v1256_v32  ;;  %v1268_v37 = vmul.f32 3.8918573e-05, %v1256_v32 }
 0x7af   : > { %v1258_v38 = vadd.f32 0.00028619796, %v1257_v36  ;;  %v1269_v39 = vadd.f32 0.001143296, %v1268_v37 }
 0x7b1   : > { %v1259_v41 = vmul.f32 %v1258_v38, %v1256_v32  ;;  %v1270_v43 = vmul.f32 %v1269_v39, %v1256_v32 }
 0x7b3   : > { %v1271_v44 = vadd.f32 0.014752088, %v1270_v43  ;;  %v1260_v45 = vadd.f32 0.0036580483, %v1259_v41 }
 0x7b5   : > { %v1272_v47 = vmul.f32 %v1271_v44, %v1256_v32  ;;  %v1261_v49 = vmul.f32 %v1260_v45, %v1256_v32 }
 0x7b7   : > { %v1273_v48 = vadd.f32 0.112945676, %v1272_v47  ;;  %v1262_v53 = vadd.f32 0.05243302, %v1261_v49 }
 0x7b9   : > { %v1274_v51 = vmul.f32 %v1273_v48, %v1256_v32  ;;  %v1263_v56 = vmul.f32 %v1262_v53, %v1256_v32 }
 0x7bb   : > { %v1275_v52 = vadd.f32 0.4994258, %v1274_v51  ;;  %v1264_v57 = vadd.f32 0.18741608, %v1263_v56 }
 0x7bd   : > { %v1276_v54 = vmul.f32 %v1275_v52, %v1256_v32  ;;  %v1265_v59 = vmul.f32 %v1264_v57, %v1256_v32 }
 0x7bf   : > { %v1277_v55 = vadd.f32 1.0, %v1276_v54  ;;  %v1266_v63 = vadd.f32 1.1283791, %v1265_v59 }
 0x7c1   : > { %2114 = vrcp.f32 %v1277_v55  ;;  %v1289_v62 = vand.u32 2147483648, %v1277_v55  ;;  %v1287_v1 = vand.u32 2147483647, %v1277_v55  ;;  %vm1283_vm1 = vweird.f32 %v1277_v55 }
 0x7c2   : > { %v1267_v5 = vmul.f32 %v1266_v63, %v1254_v30 }
 0x7c3   : > { %v1290_v4 = vor.u32 1.1754944e-38, %v1289_v62  ;;  %vm1288_vm3 = vcmp.eq.f32.partialorder %v1287_v1, 8.507059e+37 }
 0x7c7   : > { %v2115_v58 = vpop.eup %2114 }
 0x7c8   : > { %v1279_v60 = vmul.f32 %v2115_v58, %v1277_v55  ;;  %vm1284_vm15 = vweird.f32 %v2115_v58 }
 0x7c9   : > { %vm1285_vm2 = vmor %vm1283_vm1, %vm1284_vm15  ;;  %vm1567_vm1 = vcmask 122880  }
 0x7ca   : > { %v1280_v61 = vsub.f32 1.0, %v1279_v60 }
 0x7cc   : > { %v1281_v0 = vmul.f32 %v2115_v58, %v1280_v61 }
 0x7ce   : > { %v1282_v2 = vadd.f32 %v2115_v58, %v1281_v0 }
 0x7d0   : > { %v1286_v6 = vsel %vm1285_vm2, %v2115_v58, %v1282_v2 }
 0x7d1   : > { %v1291_v7 = vsel %vm1288_vm3, %v1290_v4, %v1286_v6 }
 0x7d2   : > { %v1292_v8 = vmul.f32 %v1291_v7, %v1267_v5 }
 0x7d4   : > { %v1881_v9 = vclamps-f32 %v1292_v8, 1.0 }
 0x7d6   : > { %v1295_v11 = vadd.f32 1.0, %v1881_v9 }
 0x7d8   : > { %v1296_v12 = vmul.f32 %v1295_v11, %v1253_v10 }
 0x7da   : > { %v1305_v33 = vpack.c.bf16 %v1296_v12, %v1296_v12 }
 0x7dc   : > { %1898 = vmatmul.msk.bf16.vlgmr.msra.gmra.mxu2 %vm1332_vm4, %v1305_v33 }
 0x85f   : > { %v1345_v16 = vpop.f32.mrf.mxu2 }
 0x860   : > { %v1346_v17 = vadd.f32 %v2086_v15, %v1345_v16  ;;  %v1967_v15 = vld [vmem:[#allocation7 + $0x48] sm:$0xff] }
 0x861   : > { %1490 = vmatpush.bf16.msrb.mxu0 %v1967_v15 }
 0x862   : > { %v1349_v18 = vadd.f32 %v1346_v17, %v2592_v3 }
 0x864   : > { %v1354_v19 = vpack.c.bf16 %v1349_v18, %v1349_v18 }
 0x866   : > { %1907 = vmatmul.msk.bf16.vlgmr.msra.gmra.mxu3 %vm372_vm5, %v1354_v19 }
 0x867   : > { %v1347_v20 = vpop.f32.mrf.mxu2 }
 0x8e9   : > { %v1381_v22 = vpop.f32.mrf.mxu3 }
 0x8ea   : > { %v1382_v23 = vadd.f32 %v2087_v21, %v1381_v22 }
 0x8ec   : > { %v1386_v24 = vmul.f32 0.70710677, %v1382_v23  ;;  %v1385_v62 = vmul.f32 0.5, %v1382_v23 }
 0x8ee   : > { %v1387_v25 = vmul.f32 %v1386_v24, %v1386_v24 }
 0x8f0   : > { %v1388_v26 = vmin.f32 %v1387_v25, 16.0  ;;  %v1458_v25 = vld [vmem:[#allocation5 + $0xb] sm:$0x1] }
 0x8f1   : > { %v1383_v27 = vpop.f32.mrf.mxu3 }
 0x8f2   : > { %v1389_v28 = vmul.f32 2.1237322e-06, %v1388_v26  ;;  %v1400_v29 = vmul.f32 3.8918573e-05, %v1388_v26 }
 0x8f4   : > { %v1390_v30 = vadd.f32 0.00028619796, %v1389_v28  ;;  %v1401_v31 = vadd.f32 0.001143296, %v1400_v29  ;;  %v1460_v28 = vld [vmem:[#allocation5 + $0xc] sm:$0x1] }
 0x8f6   : > { %v1391_v32 = vmul.f32 %v1390_v30, %v1388_v26  ;;  %v1402_v34 = vmul.f32 %v1401_v31, %v1388_v26 }
 0x8f8   : > { %v1403_v35 = vadd.f32 0.014752088, %v1402_v34  ;;  %v1392_v36 = vadd.f32 0.0036580483, %v1391_v32 }
 0x8fa   : > { %v1404_v3 = vmul.f32 %v1403_v35, %v1388_v26  ;;  %v1393_v38 = vmul.f32 %v1392_v36, %v1388_v26 }
 0x8fc   : > { %v1405_v37 = vadd.f32 0.112945676, %v1404_v3  ;;  %v1394_v41 = vadd.f32 0.05243302, %v1393_v38 }
 0x8fe   : > { %v1406_v39 = vmul.f32 %v1405_v37, %v1388_v26  ;;  %v1395_v45 = vmul.f32 %v1394_v41, %v1388_v26 }
 0x900   : > { %v1407_v40 = vadd.f32 0.4994258, %v1406_v39  ;;  %v1396_v46 = vadd.f32 0.18741608, %v1395_v45 }
 0x902   : > { %v1408_v43 = vmul.f32 %v1407_v40, %v1388_v26  ;;  %v1397_v48 = vmul.f32 %v1396_v46, %v1388_v26 }
 0x904   : > { %v1409_v44 = vadd.f32 1.0, %v1408_v43  ;;  %v1398_v52 = vadd.f32 1.1283791, %v1397_v48 }
 0x906   : > { %2116 = vrcp.f32 %v1409_v44  ;;  %v1421_v51 = vand.u32 2147483648, %v1409_v44  ;;  %v1419_v54 = vand.u32 2147483647, %v1409_v44  ;;  %vm1415_vm7 = vweird.f32 %v1409_v44 }
 0x907   : > { %v1399_v57 = vmul.f32 %v1398_v52, %v1386_v24 }
 0x908   : > { %v1422_v56 = vor.u32 1.1754944e-38, %v1421_v51  ;;  %vm1420_vm9 = vcmp.eq.f32.partialorder %v1419_v54, 8.507059e+37 }
 0x90c   : > { %v2117_v47 = vpop.eup %2116 }
 0x90d   : > { %v1411_v49 = vmul.f32 %v2117_v47, %v1409_v44  ;;  %vm1416_vm6 = vweird.f32 %v2117_v47 }
 0x90e   : > { %vm1417_vm8 = vmor %vm1415_vm7, %vm1416_vm6 }
 0x90f   : > { %v1412_v50 = vsub.f32 1.0, %v1411_v49 }
 0x911   : > { %v1413_v53 = vmul.f32 %v2117_v47, %v1412_v50  ;;  %v1969_v50 = vld [vmem:[#allocation7 + $0x58] sm:$0xff] }
 0x912   : > { %1560 = vmatpush.bf16.msrb.mxu1 %v1969_v50 }
 0x913   : > { %v1414_v55 = vadd.f32 %v2117_v47, %v1413_v53 }
 0x915   : > { %v1418_v58 = vsel %vm1417_vm8, %v2117_v47, %v1414_v55 }
 0x916   : > { %v1423_v59 = vsel %vm1420_vm9, %v1422_v56, %v1418_v58 }
 0x917   : > { %v1424_v60 = vmul.f32 %v1423_v59, %v1399_v57 }
 0x919   : > { %v1908_v61 = vclamps-f32 %v1424_v60, 1.0 }
 0x91b   : > { %v1427_v63 = vadd.f32 1.0, %v1908_v61 }
 0x91d   : > { %v1428_v0 = vmul.f32 %v1427_v63, %v1385_v62 }
 0x91f   : > { %v1429_v1 = vsel %vm372_vm5, %v1428_v0, -inf }
 0x920   : > { %v1430_v2 = vrot.slane %v1429_v1, 4 }
 0x922   : > { %v1431_v4 = vmax.f32 %v1429_v1, %v1430_v2 }
 0x924   : > { %v1432_v5 = vrot.slane %v1431_v4, 2 }
 0x926   : > { %v1433_v6 = vmax.f32 %v1431_v4, %v1432_v5 }
 0x928   : > { %v1434_v7 = vrot.slane %v1433_v6, 1 }
 0x92a   : > { %v1435_v8 = vmax.f32 %v1433_v6, %v1434_v7 }
 0x92c   : > { %v1436_v9 = vsel %vm372_vm5, %v1435_v8, 0.0 }
 0x92d   : > { %1437 = vadd.xlane.f32.xlu2 %v1436_v9 }
 0x9a0   : > { %v1438_v10 = vpop.xlane.xlu2 %1437 }
 0x9a1   : > { %v1439_v11 = vmul.f32 %v1438_v10, %v2533_v42 }
 0x9a3   : > { %v1440_v12 = vsub.f32 %v1435_v8, %v1439_v11 }
 0x9a5   : > { %v1441_v33 = vmul.f32 %v1440_v12, %v1440_v12 }
 0x9a7   : > { %v1442_v13 = vsel %vm372_vm5, %v1441_v33, 0.0 }
 0x9a8   : > { %1443 = vadd.xlane.f32.xlu0 %v1442_v13  ;;  %v1543_v13 = vld [vmem:[#allocation5 + $0xe] sm:$0x1] }
 0xa1b   : > { %v1444_v16 = vpop.xlane.xlu0 %1443 }
 0xa1c   : > { %v1445_v17 = vmul.f32 %v1444_v16, %v2533_v42  ;;  %v1467_v42 = vld [vmem:[#allocation5 + $0xd] sm:$0x1] }
 0xa1e   : > { %v1446_v18 = vadd.f32 1e-05, %v1445_v17 }
 0xa20   : > { %2118 = vrsqrt.f32 %v1446_v18  ;;  %vm1453_vm11 = vweird.f32 %v1446_v18 }
 0xa26   : > { %v2119_v19 = vpop.eup %2118 }
 0xa27   : > { %v1448_v20 = vmul.f32 %v2119_v19, %v1446_v18  ;;  %vm1454_vm10 = vweird.f32 %v2119_v19 }
 0xa28   : > { %vm1455_vm12 = vmor %vm1453_vm11, %vm1454_vm10 }
 0xa29   : > { %v1449_v21 = vmul.f32 %v2119_v19, %v1448_v20 }
 0xa2b   : > { %v1450_v22 = vmul.f32 0.5, %v1449_v21 }
 0xa2d   : > { %v1451_v23 = vsub.f32 1.5, %v1450_v22 }
 0xa2f   : > { %v1452_v24 = vmul.f32 %v2119_v19, %v1451_v23 }
 0xa31   : > { %v1456_v26 = vsel %vm1455_vm12, %v2119_v19, %v1452_v24 }
 0xa32   : > { %v1457_v27 = vmul.f32 %v1456_v26, %v1440_v12 }
 0xa34   : > { %v1459_v29 = vmul.f32 %v1458_v25, %v1457_v27 }
 0xa36   : > { %v1461_v30 = vadd.f32 %v1460_v28, %v1459_v29 }
 0xa38   : > { %v1466_v31 = vpack.c.bf16 %v1461_v30, %v1461_v30 }
 0xa3a   : > { %1917 = vmatmul.msk.bf16.vlgmr.msrb.gmra.mxu0 %vm372_vm5, %v1466_v31 }
 0xab7   : > { %v1492_v32 = vpop.f32.mrf.mxu0 }
 0xab8   : > { %v1493_v34 = vadd.f32 %v1492_v32, %v1467_v42 }
 0xaba   : > { %v1497_v35 = vmul.f32 0.70710677, %v1493_v34  ;;  %v1496_v10 = vmul.f32 0.5, %v1493_v34 }
 0xabc   : > { %v1498_v36 = vmul.f32 %v1497_v35, %v1497_v35 }
 0xabe   : > { %v1499_v3 = vmin.f32 %v1498_v36, 16.0 }
 0xabf   : > { %v1494_v37 = vpop.f32.mrf.mxu0 }
 0xac0   : > { %v1500_v38 = vmul.f32 2.1237322e-06, %v1499_v3  ;;  %v1511_v39 = vmul.f32 3.8918573e-05, %v1499_v3 }
 0xac2   : > { %v1501_v40 = vadd.f32 0.00028619796, %v1500_v38  ;;  %v1512_v41 = vadd.f32 0.001143296, %v1511_v39 }
 0xac4   : > { %v1502_v43 = vmul.f32 %v1501_v40, %v1499_v3  ;;  %v1513_v44 = vmul.f32 %v1512_v41, %v1499_v3 }
 0xac6   : > { %v1514_v45 = vadd.f32 0.014752088, %v1513_v44  ;;  %v1503_v46 = vadd.f32 0.0036580483, %v1502_v43 }
 0xac8   : > { %v1515_v47 = vmul.f32 %v1514_v45, %v1499_v3  ;;  %v1504_v49 = vmul.f32 %v1503_v46, %v1499_v3 }
 0xaca   : > { %v1516_v48 = vadd.f32 0.112945676, %v1515_v47  ;;  %v1505_v53 = vadd.f32 0.05243302, %v1504_v49 }
 0xacc   : > { %v1517_v51 = vmul.f32 %v1516_v48, %v1499_v3  ;;  %v1506_v56 = vmul.f32 %v1505_v53, %v1499_v3 }
 0xace   : > { %v1518_v52 = vadd.f32 0.4994258, %v1517_v51  ;;  %v1507_v57 = vadd.f32 0.18741608, %v1506_v56 }
 0xad0   : > { %v1519_v54 = vmul.f32 %v1518_v52, %v1499_v3  ;;  %v1508_v59 = vmul.f32 %v1507_v57, %v1499_v3 }
 0xad2   : > { %v1520_v55 = vadd.f32 1.0, %v1519_v54  ;;  %v1509_v63 = vadd.f32 1.1283791, %v1508_v59 }
 0xad4   : > { %2120 = vrcp.f32 %v1520_v55  ;;  %v1532_v62 = vand.u32 2147483648, %v1520_v55  ;;  %v1530_v1 = vand.u32 2147483647, %v1520_v55  ;;  %vm1526_vm13 = vweird.f32 %v1520_v55 }
 0xad5   : > { %v1510_v5 = vmul.f32 %v1509_v63, %v1497_v35 }
 0xad6   : > { %v1533_v4 = vor.u32 1.1754944e-38, %v1532_v62  ;;  %vm1531_vm15 = vcmp.eq.f32.partialorder %v1530_v1, 8.507059e+37 }
 0xada   : > { %v2121_v58 = vpop.eup %2120 }
 0xadb   : > { %v1522_v60 = vmul.f32 %v2121_v58, %v1520_v55  ;;  %vm1527_vm5 = vweird.f32 %v2121_v58 }
 0xadc   : > { %vm1528_vm14 = vmor %vm1526_vm13, %vm1527_vm5 }
 0xadd   : > { %v1523_v61 = vsub.f32 1.0, %v1522_v60 }
 0xadf   : > { %v1524_v0 = vmul.f32 %v2121_v58, %v1523_v61 }
 0xae1   : > { %v1525_v2 = vadd.f32 %v2121_v58, %v1524_v0 }
 0xae3   : > { %v1529_v6 = vsel %vm1528_vm14, %v2121_v58, %v1525_v2 }
 0xae4   : > { %v1534_v7 = vsel %vm1531_vm15, %v1533_v4, %v1529_v6 }
 0xae5   : > { %v1535_v8 = vmul.f32 %v1534_v7, %v1510_v5 }
 0xae7   : > { %v1918_v9 = vclamps-f32 %v1535_v8, 1.0 }
 0xae9   : > { %v1538_v11 = vadd.f32 1.0, %v1918_v9 }
 0xaeb   : > { %v1539_v12 = vmul.f32 %v1538_v11, %v1496_v10 }
 0xaed   : > { %v1542_v33 = vpack.c.bf16 %v1539_v12, %v1539_v12 }
 0xaef   : > { %1923 = vmatmul.msk.bf16.vlgmr.msrb.gmra.mxu1 %vm309_vm0, %v1542_v33 }
 0xb6c   : > { %v1562_v14 = vpop.f32.mrf.mxu1 }
 0xb6d   : > { %v1563_v15 = vadd.f32 %v1562_v14, %v1543_v13 }
 0xb6f   : > { %v1566_v16 = vmul.f32 %v1563_v15, %v1563_v15 }
 0xb71   : > { %v1568_v17 = vsel %vm1567_vm1, %v1566_v16, 0.0 }
 0xb72   : > { %1569 = vadd.xlane.f32.xlu1 %v1568_v17 }
 0xb74   : > { %v1564_v18 = vpop.f32.mrf.mxu1 }
 0xbe5   : > { %v1570_v19 = vpop.xlane.xlu1 %1569 }
 0xbe6   : > { %2122 = vrsqrt.f32 %v1570_v19  ;;  %vm1577_vm2 = vweird.f32 %v1570_v19 }
 0xbec   : > { %v2123_v20 = vpop.eup %2122 }
 0xbed   : > { %v1572_v21 = vmul.f32 %v2123_v20, %v1570_v19  ;;  %vm1578_vm0 = vweird.f32 %v2123_v20 }
 0xbee   : > { %vm1579_vm3 = vmor %vm1577_vm2, %vm1578_vm0 }
 0xbef   : > { %v1573_v22 = vmul.f32 %v2123_v20, %v1572_v21 }
 0xbf1   : > { %v1574_v23 = vmul.f32 0.5, %v1573_v22 }
 0xbf3   : > { %v1575_v24 = vsub.f32 1.5, %v1574_v23 }
 0xbf5   : > { %v1576_v25 = vmul.f32 %v2123_v20, %v1575_v24 }
 0xbf7   : > { %v1580_v26 = vsel %vm1579_vm3, %v2123_v20, %v1576_v25 }
 0xbf8   : > { %v1581_v27 = vmul.f32 %v1580_v26, %v1563_v15 }
 0xbfa   : > { %1582 = vst.msk [vmem:[%s306_s6] sm:$0x1] %vm1567_vm1, %v1581_v27 }
 0xbfb   : > { %2301 = shalt.err (!%p2298_p9)
}
 0xbfc   : > { %1988 = dma.vmem_to_hbm [thread:$0]  (%p2479_p4), %s1595_s7, 16, %s1597_s8, %s1584_s10  }
 0xbfd PF: > { %s1608_s14 = sand.u32 1, %s2336_s18   ;;  %p2659_p10 = scmp.ge.s32.totalorder %s2348_s21, 2 }
 0xbfe   : > { %s1609_s28 = scalar_lea.sflag [#allocation4], %s1608_s14 }
 0xbff   : > { %p2008_p13 = pnand %p2659_p10, %p2483_p6 }
 0xc01   : > { %p2009_p11 = pneg %p2008_p13 }
 0xc03   : > { %2331 = dma.done.wait (%p2009_p11), %s1609_s28, 16  }
 0xc04   : > { %2333 = vsyncadd (%p2009_p11), %s1609_s28, 4294967280  ;;  %p20_p0 = scmp.ge.s32.totalorder %s2453_s9, 4   ;;  %s2660_s18 = smov %s2340_s19 }
 0xc05   : > { %s2661_s19 = smov %s2344_s20  ;;  %s2662_s20 = smov %s2464_s12 }
 0xc06   : > { %s2663_s21 = smov %s2453_s9  ;;  %22 = sbr.rel (!%p20_p0) target bundleno = 7 (0x7), region = 106 }
 0xc0b   :  { %1614 = vsyncpa [#allocation3], 1 }
 0xc0c   :  { %1616 = vsyncpa [#allocation3 + $0x1], 1 }
 0xc0d   :  { %1617 = vsyncpa [#allocation6], 1 }
 0xc0e   :  { %1618 = vsyncpa [#allocation9], 1 }
 0xc0f   :  { %1619 = vsyncpa [#allocation4], 1 }
 0xc10   :  { %1621 = vsyncpa [#allocation4 + $0x1], 1 }

</bundles_post_ra>
